<compile_context>
chip_gen: v7x
topology: tpu7x:2x2x1
jax: 0.10.0
libtpu: 0.0.40
codegen_flags: <defaults>
</compile_context>

<pallas_src>
import functools

import jax
import jax.numpy as jnp
from jax.experimental import pallas as pl
from jax.experimental.pallas import tpu as pltpu


def _round_up(x, m):
    return ((x + m - 1) // m) * m


def _vmem_capacity_bytes():
    try:
        cap = getattr(pltpu.get_tpu_info(), "vmem_capacity_bytes", None)
        if cap:
            return int(cap)
    except Exception:
        pass
    return 128 * 1024 * 1024   # v5e/v6e default; v7x reports 64 MiB when the query works


# ------------------------- shared per-tile conv helper -----------------------
def _fused_conv_tile(x_views, w_ref, b_ref, tap_ref, offsets, tile_p, cin):
    """One (Cout, tile_p) conv tile: stack 27 lane-shifted slices -> single MXU GEMM."""
    # (Cin, n_views*tile_p): this tile plus its conv halo (lane-aligned concat, n_views ~ 2).
    x_ext = jnp.concatenate([v[0] for v in x_views], axis=1)
    for k, off in enumerate(offsets):            # static unroll, static slices
        tap_ref[k * cin:(k + 1) * cin, :] = x_ext[:, off:off + tile_p]
    return jnp.dot(w_ref[...], tap_ref[...],
                   preferred_element_type=jnp.float32) + b_ref[...]


# ------------------- fast path: single pass, conv stays in VMEM --------------
def _make_single_pass_kernel(n_views, offsets, tile_p, cin, cnt, eps):
    def kernel(*refs):
        x_views = refs[:n_views]
        w_ref, b_ref, mask_ref, g_ref, bt_ref = refs[n_views:n_views + 5]
        o_ref = refs[n_views + 5]
        tap_ref = refs[n_views + 6]

        mi = pl.program_id(1)
        conv = _fused_conv_tile(x_views, w_ref, b_ref, tap_ref, offsets, tile_p, cin)
        base = pl.multiple_of(mi * tile_p, 128)
        o_ref[0, :, pl.ds(base, tile_p)] = conv   # resident output block across the M axis

        # Last M step: full-sample conv is resident -> exact (two-pass) InstanceNorm
        # stats over valid voxels, affine + LeakyReLU in place, single HBM write.
        @pl.when(mi == pl.num_programs(1) - 1)
        def _():
            full = o_ref[0]                        # (Cout, p_out), VMEM resident
            m = mask_ref[...]                      # (1, p_out), 1.0 on valid voxels
            valid = jnp.where(m > 0.0, full, 0.0)  # NaN-safe masking
            mean = jnp.sum(valid, axis=1, keepdims=True) * (1.0 / cnt)
            diff = jnp.where(m > 0.0, full - mean, 0.0)
            var = jnp.sum(diff * diff, axis=1, keepdims=True) * (1.0 / cnt)
            inv = jax.lax.rsqrt(var + eps)
            scale = g_ref[...] * inv
            shift = bt_ref[...] - mean * scale
            y = full * scale + shift
            o_ref[0] = jnp.where(y >= 0.0, y, 0.01 * y)
    return kernel


# --------------- fallback pass A: conv tiles + streaming statistics ----------
def _make_conv_stats_kernel(n_views, offsets, tile_p, cin):
    def kernel(*refs):
        x_views = refs[:n_views]
        w_ref, b_ref, mask_ref = refs[n_views:n_views + 3]
        conv_ref, sum_ref, ssq_ref = refs[n_views + 3:n_views + 6]
        tap_ref = refs[n_views + 6]

        @pl.when(pl.program_id(1) == 0)
        def _():
            sum_ref[...] = jnp.zeros_like(sum_ref)
            ssq_ref[...] = jnp.zeros_like(ssq_ref)

        conv = _fused_conv_tile(x_views, w_ref, b_ref, tap_ref, offsets, tile_p, cin)
        conv_ref[0] = conv

        m = mask_ref[...]                               # (1, tile_p)
        masked = jnp.where(m > 0.0, conv, 0.0)          # NaN-safe vs. `conv * m`
        sum_ref[0] = sum_ref[0] + jnp.sum(masked, axis=1, keepdims=True)
        ssq_ref[0] = ssq_ref[0] + jnp.sum(masked * masked, axis=1, keepdims=True)
    return kernel


# --------------- fallback pass B: normalize + LeakyReLU (streaming) ----------
def _norm_act_kernel(conv_ref, scale_ref, shift_ref, o_ref):
    y = conv_ref[0] * scale_ref[0] + shift_ref[0]       # lane-dense (Cout, tile)
    o_ref[0] = jnp.where(y >= 0.0, y, 0.01 * y).astype(o_ref.dtype)


# ------------------------------ JAX wrapper ----------------------------------
@functools.partial(jax.jit, static_argnames=("tile_p", "force_two_pass"))
def decoder_block_forward(x, weight, bias, gamma, beta, *,
                          tile_p=None, force_two_pass=False):
    """x: (N, Cin, D, H, W) f32; weight: (Cout, Cin, 3, 3, 3); bias/gamma/beta: (Cout,)."""
    n, cin, d, h, w = x.shape
    cout = weight.shape[0]
    dp, hp, wp = d + 2, h + 2, w + 2
    eps = 1e-5

    plane = hp * wp
    p_valid = d * plane                      # flattened (d, hp, wp) output grid
    max_off = 2 * plane + 2 * wp + 2         # largest conv-tap offset in flat coords
    cnt = float(d * h * w)                   # valid voxels per (n, c) instance

    cap = _vmem_capacity_bytes()
    budget = cap // 2                                       # target for rough estimates
    vmem_limit = min(int(0.75 * cap), 112 * 1024 * 1024)    # compiler scoped-VMEM limit

    # --- tile selection: big, plane-aware; shrink only if the estimate busts VMEM ---
    if tile_p is None:
        tile_p = max(2048, 2 * plane)
    tp = max(128, min(_round_up(tile_p, 128), _round_up(p_valid, 128)))

    def views_for(t):
        return pl.cdiv(max_off, t) + 1

    def pass_a_bytes(t):
        nv = views_for(t)
        return 4 * (2 * nv * cin * t       # double-buffered x view blocks
                    + 27 * cin * t         # fused tap operand scratch
                    + nv * cin * t         # x_ext temporary
                    + 4 * cout * t         # conv tile (double-buffered out + temps)
                    + 2 * t) + (1 << 20)   # mask + slack

    while pass_a_bytes(tp) > budget and tp > 256:
        tp = max(256, _round_up(tp // 2, 128))

    n_views = views_for(tp)
    num_m = pl.cdiv(p_valid, tp)
    p_out = num_m * tp
    p_x = (num_m - 1 + n_views) * tp         # furthest element any view block touches

    # --- single merged pad: conv halo + enough trailing zero planes so every view
    #     block is backed by real (zero) data; flatten is a free row-major reshape ---
    need_extra = max(0, p_x - dp * plane)
    d_extra = -(-need_extra // plane)        # ceil division
    x_pad = jnp.pad(x.astype(jnp.float32),
                    ((0, 0), (0, 0), (1, 1 + d_extra), (1, 1), (1, 1)))
    x_flat = x_pad.reshape(n, cin, (dp + d_extra) * plane)

    # Fused weight: K index = tap * Cin + cin_index, matching the tap stacking order.
    w_fused = jnp.transpose(weight, (0, 2, 3, 4, 1)).reshape(cout, 27 * cin).astype(jnp.float32)
    b_col = bias.reshape(cout, 1).astype(jnp.float32)
    g_col = gamma.reshape(cout, 1).astype(jnp.float32)
    bt_col = beta.reshape(cout, 1).astype(jnp.float32)

    mask3 = jnp.zeros((d, hp, wp), jnp.float32).at[:, :h, :w].set(1.0)
    mask = jnp.pad(mask3.reshape(1, p_valid), ((0, 0), (0, p_out - p_valid)))

    offsets = tuple(kd * plane + kh * wp + kw
                    for kd in range(3) for kh in range(3) for kw in range(3))

    x_specs = [pl.BlockSpec((1, cin, tp), lambda ni, mi, v=v: (ni, 0, mi + v))
               for v in range(n_views)]
    tap_scratch = pltpu.VMEM((27 * cin, tp), jnp.float32)

    def fast_bytes():
        return 4 * (2 * n_views * cin * tp + 27 * cin * tp + n_views * cin * tp
                    + 5 * cout * p_out        # resident out block (x2) + epilogue temps
                    + 2 * p_out) + (1 << 20)

    use_fast = (not force_two_pass) and fast_bytes() <= budget

    if use_fast:
        # ---------- single pass: conv -> resident VMEM block -> norm + act -> HBM ----------
        y_flat = pl.pallas_call(
            _make_single_pass_kernel(n_views, offsets, tp, cin, cnt, eps),
            out_shape=jax.ShapeDtypeStruct((n, cout, p_out), jnp.float32),
            grid_spec=pltpu.PrefetchScalarGridSpec(
                num_scalar_prefetch=0,
                grid=(n, num_m),
                in_specs=x_specs + [
                    pl.BlockSpec((cout, 27 * cin), lambda ni, mi: (0, 0)),
                    pl.BlockSpec((cout, 1), lambda ni, mi: (0, 0)),
                    pl.BlockSpec((1, p_out), lambda ni, mi: (0, 0)),
                    pl.BlockSpec((cout, 1), lambda ni, mi: (0, 0)),
                    pl.BlockSpec((cout, 1), lambda ni, mi: (0, 0)),
                ],
                out_specs=pl.BlockSpec((1, cout, p_out), lambda ni, mi: (ni, 0, 0)),
                scratch_shapes=[tap_scratch],
            ),
            compiler_params=pltpu.CompilerParams(
                dimension_semantics=("parallel", "arbitrary"),
                vmem_limit_bytes=vmem_limit,
            ),
        )(*([x_flat] * n_views + [w_fused, b_col, mask, g_col, bt_col]))
    else:
        # ---------------- pass A: conv tiles + per-(n, c) streaming statistics ------------
        conv_out, s1, s2 = pl.pallas_call(
            _make_conv_stats_kernel(n_views, offsets, tp, cin),
            out_shape=(
                jax.ShapeDtypeStruct((n, cout, p_out), jnp.float32),
                jax.ShapeDtypeStruct((n, cout, 1), jnp.float32),
                jax.ShapeDtypeStruct((n, cout, 1), jnp.float32),
            ),
            grid_spec=pltpu.PrefetchScalarGridSpec(
                num_scalar_prefetch=0,
                grid=(n, num_m),
                in_specs=x_specs + [
                    pl.BlockSpec((cout, 27 * cin), lambda ni, mi: (0, 0)),
                    pl.BlockSpec((cout, 1), lambda ni, mi: (0, 0)),
                    pl.BlockSpec((1, tp), lambda ni, mi: (0, mi)),
                ],
                out_specs=(
                    pl.BlockSpec((1, cout, tp), lambda ni, mi: (ni, 0, mi)),
                    pl.BlockSpec((1, cout, 1), lambda ni, mi: (ni, 0, 0)),   # resident acc
                    pl.BlockSpec((1, cout, 1), lambda ni, mi: (ni, 0, 0)),   # resident acc
                ),
                scratch_shapes=[tap_scratch],
            ),
            compiler_params=pltpu.CompilerParams(
                dimension_semantics=("parallel", "arbitrary"),
                vmem_limit_bytes=vmem_limit,
            ),
        )(*([x_flat] * n_views + [w_fused, b_col, mask]))

        # ---- finalize stats (O(N*Cout)): biased variance, PyTorch semantics ----
        cnt_a = jnp.float32(cnt)
        mean = s1 / cnt_a
        var = jnp.maximum(s2 / cnt_a - mean * mean, 0.0)
        inv = jax.lax.rsqrt(var + eps)
        scale = gamma.reshape(1, cout, 1).astype(jnp.float32) * inv
        shift = beta.reshape(1, cout, 1).astype(jnp.float32) - mean * scale

        # ---------------- pass B: normalize + LeakyReLU, coarse fully parallel grid --------
        per_unit = 4 * 6 * cout * tp                       # rough bytes per tp of pass B
        factor = max(1, min(num_m, budget // max(1, per_unit)))
        tpb = tp * factor
        num_mb = pl.cdiv(p_out, tpb)
        y_flat = pl.pallas_call(
            _norm_act_kernel,
            out_shape=jax.ShapeDtypeStruct((n, cout, p_out), jnp.float32),
            grid_spec=pltpu.PrefetchScalarGridSpec(
                num_scalar_prefetch=0,
                grid=(n, num_mb),
                in_specs=[
                    pl.BlockSpec((1, cout, tpb), lambda ni, mi: (ni, 0, mi)),
                    pl.BlockSpec((1, cout, 1), lambda ni, mi: (ni, 0, 0)),
                    pl.BlockSpec((1, cout, 1), lambda ni, mi: (ni, 0, 0)),
                ],
                out_specs=pl.BlockSpec((1, cout, tpb), lambda ni, mi: (ni, 0, mi)),
            ),
            compiler_params=pltpu.CompilerParams(
                dimension_semantics=("parallel", "parallel"),
                vmem_limit_bytes=vmem_limit,
            ),
        )(conv_out, scale, shift)

    # Drop the padded (h, w) border lanes; already channels-first -> no transpose.
    y = y_flat[:, :, :p_valid].reshape(n, cout, d, hp, wp)[:, :, :, :h, :w]
    return y


# ------------------------------ pure-JAX reference ---------------------------
def _reference(x_ncdhw, weight, bias, gamma, beta):
    conv = jax.lax.conv_general_dilated(
        x_ncdhw, weight,
        window_strides=(1, 1, 1),
        padding=[(1, 1), (1, 1), (1, 1)],
        dimension_numbers=("NCDHW", "OIDHW", "NCDHW"),
    ) + bias.reshape(1, -1, 1, 1, 1)
    mean = jnp.mean(conv, axis=(2, 3, 4), keepdims=True)
    var = jnp.mean((conv - mean) ** 2, axis=(2, 3, 4), keepdims=True)
    y = (conv - mean) * jax.lax.rsqrt(var + 1e-5)
    y = y * gamma.reshape(1, -1, 1, 1, 1) + beta.reshape(1, -1, 1, 1, 1)
    return jnp.where(y >= 0.0, y, 0.01 * y)


if __name__ == "__main__":
    # Small shapes consistent with DecoderBlock(in_channels=4, out_channels=8).
    N, CIN, COUT, D, H, W = 2, 4, 8, 8, 8, 8

    key = jax.random.PRNGKey(0)
    kx, kw, kb, kg, kbeta = jax.random.split(key, 5)

    x = jax.random.normal(kx, (N, CIN, D, H, W), dtype=jnp.float32)
    weight = jax.random.normal(kw, (COUT, CIN, 3, 3, 3), dtype=jnp.float32) * 0.1
    bias = jax.random.normal(kb, (COUT,), dtype=jnp.float32) * 0.1
    gamma = 1.0 + 0.1 * jax.random.normal(kg, (COUT,), dtype=jnp.float32)
    beta = 0.1 * jax.random.normal(kbeta, (COUT,), dtype=jnp.float32)

    ref = jax.block_until_ready(_reference(x, weight, bias, gamma, beta))

    # 1) single-pass fast path (default big tile, one M step per sample)
    out = jax.block_until_ready(decoder_block_forward(x, weight, bias, gamma, beta))
    assert out.shape == (N, COUT, D, H, W), out.shape
    assert jnp.allclose(out, ref, rtol=1e-3, atol=1e-3), float(jnp.max(jnp.abs(out - ref)))

    # 2) single-pass fast path, multiple M tiles (exercises the resident-output epilogue)
    out2 = jax.block_until_ready(
        decoder_block_forward(x, weight, bias, gamma, beta, tile_p=256))
    assert jnp.allclose(out2, ref, rtol=1e-3, atol=1e-3), float(jnp.max(jnp.abs(out2 - ref)))

    # 3) two-pass fallback path (streaming stats + separate normalization pass)
    out3 = jax.block_until_ready(
        decoder_block_forward(x, weight, bias, gamma, beta, tile_p=256, force_two_pass=True))
    assert jnp.allclose(out3, ref, rtol=1e-3, atol=1e-3), float(jnp.max(jnp.abs(out3 - ref)))

    print("KERNEL_OK")
</pallas_src>

<mosaic_0001>
module attributes {stable_mosaic.version = 11 : i64} {
  func.func @kernel(%arg0: i32, %arg1: i32, %arg2: memref<1x4x896xf32, #tpu.memory_space<vmem>>, %arg3: memref<1x4x896xf32, #tpu.memory_space<vmem>>, %arg4: memref<8x108xf32, #tpu.memory_space<vmem>>, %arg5: memref<8x1xf32, #tpu.memory_space<vmem>>, %arg6: memref<1x896xf32, #tpu.memory_space<vmem>>, %arg7: memref<8x1xf32, #tpu.memory_space<vmem>>, %arg8: memref<8x1xf32, #tpu.memory_space<vmem>>, %arg9: memref<1x8x896xf32, #tpu.memory_space<vmem>>, %arg10: memref<108x896xf32, #tpu.memory_space<vmem>>) attributes {dimension_semantics = [#tpu.dimension_semantics<parallel>, #tpu.dimension_semantics<arbitrary>], iteration_bounds = array<i64: 2, 1>, scalar_prefetch = 0 : i64, scratch_operands = 1 : i64, tpu.core_type = #tpu.core_type<tc>, window_params = [{transform_indices = @transform_0, window_bounds = array<i64: 1, 4, 896>}, {transform_indices = @transform_1, window_bounds = array<i64: 1, 4, 896>}, {pipeline_mode = #tpu.pipeline_mode<synchronous>, transform_indices = @transform_2, window_bounds = array<i64: 8, 108>}, {pipeline_mode = #tpu.pipeline_mode<synchronous>, transform_indices = @transform_3, window_bounds = array<i64: 8, 1>}, {pipeline_mode = #tpu.pipeline_mode<synchronous>, transform_indices = @transform_4, window_bounds = array<i64: 1, 896>}, {pipeline_mode = #tpu.pipeline_mode<synchronous>, transform_indices = @transform_5, window_bounds = array<i64: 8, 1>}, {pipeline_mode = #tpu.pipeline_mode<synchronous>, transform_indices = @transform_6, window_bounds = array<i64: 8, 1>}, {transform_indices = @transform_7, window_bounds = array<i64: 1, 8, 896>}]} {
    %c0 = arith.constant 0 : index
    %c0_0 = arith.constant 0 : index
    %c0_1 = arith.constant 0 : index
    %0 = vector.load %arg2[%c0, %c0_0, %c0_1] : memref<1x4x896xf32, #tpu.memory_space<vmem>>, vector<1x4x896xf32>
    %1 = vector.shape_cast %0 : vector<1x4x896xf32> to vector<4x896xf32>
    %c0_2 = arith.constant 0 : index
    %c0_3 = arith.constant 0 : index
    %c0_4 = arith.constant 0 : index
    %2 = vector.load %arg3[%c0_2, %c0_3, %c0_4] : memref<1x4x896xf32, #tpu.memory_space<vmem>>, vector<1x4x896xf32>
    %3 = vector.shape_cast %2 : vector<1x4x896xf32> to vector<4x896xf32>
    %4 = tpu.concatenate %1, %3 in 1 : vector<4x896xf32>, vector<4x896xf32> -> vector<4x1792xf32>
    %5 = vector.extract_strided_slice %4 {offsets = [0, 0], sizes = [4, 896], strides = [1, 1]} : vector<4x1792xf32> to vector<4x896xf32>
    %c0_5 = arith.constant 0 : index
    %c0_6 = arith.constant 0 : index
    %6 = vector.load %arg10[%c0_5, %c0_6] : memref<108x896xf32, #tpu.memory_space<vmem>>, vector<4x896xf32>
    tpu.vector_store %arg10[%c0_5, %c0_6], %5 {strides = array<i32>} : memref<108x896xf32, #tpu.memory_space<vmem>>, vector<4x896xf32>,
    %7 = vector.extract_strided_slice %4 {offsets = [0, 1], sizes = [4, 896], strides = [1, 1]} : vector<4x1792xf32> to vector<4x896xf32>
    %c4 = arith.constant 4 : index
    %c0_7 = arith.constant 0 : index
    %8 = vector.load %arg10[%c4, %c0_7] : memref<108x896xf32, #tpu.memory_space<vmem>>, vector<4x896xf32>
    tpu.vector_store %arg10[%c4, %c0_7], %7 {strides = array<i32>} : memref<108x896xf32, #tpu.memory_space<vmem>>, vector<4x896xf32>,
    %9 = vector.extract_strided_slice %4 {offsets = [0, 2], sizes = [4, 896], strides = [1, 1]} : vector<4x1792xf32> to vector<4x896xf32>
    %c8 = arith.constant 8 : index
    %c0_8 = arith.constant 0 : index
    %10 = vector.load %arg10[%c8, %c0_8] : memref<108x896xf32, #tpu.memory_space<vmem>>, vector<4x896xf32>
    tpu.vector_store %arg10[%c8, %c0_8], %9 {strides = array<i32>} : memref<108x896xf32, #tpu.memory_space<vmem>>, vector<4x896xf32>,
    %11 = vector.extract_strided_slice %4 {offsets = [0, 10], sizes = [4, 896], strides = [1, 1]} : vector<4x1792xf32> to vector<4x896xf32>
    %c12 = arith.constant 12 : index
    %c0_9 = arith.constant 0 : index
    %12 = vector.load %arg10[%c12, %c0_9] : memref<108x896xf32, #tpu.memory_space<vmem>>, vector<4x896xf32>
    tpu.vector_store %arg10[%c12, %c0_9], %11 {strides = array<i32>} : memref<108x896xf32, #tpu.memory_space<vmem>>, vector<4x896xf32>,
    %13 = vector.extract_strided_slice %4 {offsets = [0, 11], sizes = [4, 896], strides = [1, 1]} : vector<4x1792xf32> to vector<4x896xf32>
    %c16 = arith.constant 16 : index
    %c0_10 = arith.constant 0 : index
    %14 = vector.load %arg10[%c16, %c0_10] : memref<108x896xf32, #tpu.memory_space<vmem>>, vector<4x896xf32>
    tpu.vector_store %arg10[%c16, %c0_10], %13 {strides = array<i32>} : memref<108x896xf32, #tpu.memory_space<vmem>>, vector<4x896xf32>,
    %15 = vector.extract_strided_slice %4 {offsets = [0, 12], sizes = [4, 896], strides = [1, 1]} : vector<4x1792xf32> to vector<4x896xf32>
    %c20 = arith.constant 20 : index
    %c0_11 = arith.constant 0 : index
    %16 = vector.load %arg10[%c20, %c0_11] : memref<108x896xf32, #tpu.memory_space<vmem>>, vector<4x896xf32>
    tpu.vector_store %arg10[%c20, %c0_11], %15 {strides = array<i32>} : memref<108x896xf32, #tpu.memory_space<vmem>>, vector<4x896xf32>,
    %17 = vector.extract_strided_slice %4 {offsets = [0, 20], sizes = [4, 896], strides = [1, 1]} : vector<4x1792xf32> to vector<4x896xf32>
    %c24 = arith.constant 24 : index
    %c0_12 = arith.constant 0 : index
    %18 = vector.load %arg10[%c24, %c0_12] : memref<108x896xf32, #tpu.memory_space<vmem>>, vector<4x896xf32>
    tpu.vector_store %arg10[%c24, %c0_12], %17 {strides = array<i32>} : memref<108x896xf32, #tpu.memory_space<vmem>>, vector<4x896xf32>,
    %19 = vector.extract_strided_slice %4 {offsets = [0, 21], sizes = [4, 896], strides = [1, 1]} : vector<4x1792xf32> to vector<4x896xf32>
    %c28 = arith.constant 28 : index
    %c0_13 = arith.constant 0 : index
    %20 = vector.load %arg10[%c28, %c0_13] : memref<108x896xf32, #tpu.memory_space<vmem>>, vector<4x896xf32>
    tpu.vector_store %arg10[%c28, %c0_13], %19 {strides = array<i32>} : memref<108x896xf32, #tpu.memory_space<vmem>>, vector<4x896xf32>,
    %21 = vector.extract_strided_slice %4 {offsets = [0, 22], sizes = [4, 896], strides = [1, 1]} : vector<4x1792xf32> to vector<4x896xf32>
    %c32 = arith.constant 32 : index
    %c0_14 = arith.constant 0 : index
    %22 = vector.load %arg10[%c32, %c0_14] : memref<108x896xf32, #tpu.memory_space<vmem>>, vector<4x896xf32>
    tpu.vector_store %arg10[%c32, %c0_14], %21 {strides = array<i32>} : memref<108x896xf32, #tpu.memory_space<vmem>>, vector<4x896xf32>,
    %23 = vector.extract_strided_slice %4 {offsets = [0, 100], sizes = [4, 896], strides = [1, 1]} : vector<4x1792xf32> to vector<4x896xf32>
    %c36 = arith.constant 36 : index
    %c0_15 = arith.constant 0 : index
    %24 = vector.load %arg10[%c36, %c0_15] : memref<108x896xf32, #tpu.memory_space<vmem>>, vector<4x896xf32>
    tpu.vector_store %arg10[%c36, %c0_15], %23 {strides = array<i32>} : memref<108x896xf32, #tpu.memory_space<vmem>>, vector<4x896xf32>,
    %25 = vector.extract_strided_slice %4 {offsets = [0, 101], sizes = [4, 896], strides = [1, 1]} : vector<4x1792xf32> to vector<4x896xf32>
    %c40 = arith.constant 40 : index
    %c0_16 = arith.constant 0 : index
    %26 = vector.load %arg10[%c40, %c0_16] : memref<108x896xf32, #tpu.memory_space<vmem>>, vector<4x896xf32>
    tpu.vector_store %arg10[%c40, %c0_16], %25 {strides = array<i32>} : memref<108x896xf32, #tpu.memory_space<vmem>>, vector<4x896xf32>,
    %27 = vector.extract_strided_slice %4 {offsets = [0, 102], sizes = [4, 896], strides = [1, 1]} : vector<4x1792xf32> to vector<4x896xf32>
    %c44 = arith.constant 44 : index
    %c0_17 = arith.constant 0 : index
    %28 = vector.load %arg10[%c44, %c0_17] : memref<108x896xf32, #tpu.memory_space<vmem>>, vector<4x896xf32>
    tpu.vector_store %arg10[%c44, %c0_17], %27 {strides = array<i32>} : memref<108x896xf32, #tpu.memory_space<vmem>>, vector<4x896xf32>,
    %29 = vector.extract_strided_slice %4 {offsets = [0, 110], sizes = [4, 896], strides = [1, 1]} : vector<4x1792xf32> to vector<4x896xf32>
    %c48 = arith.constant 48 : index
    %c0_18 = arith.constant 0 : index
    %30 = vector.load %arg10[%c48, %c0_18] : memref<108x896xf32, #tpu.memory_space<vmem>>, vector<4x896xf32>
    tpu.vector_store %arg10[%c48, %c0_18], %29 {strides = array<i32>} : memref<108x896xf32, #tpu.memory_space<vmem>>, vector<4x896xf32>,
    %31 = vector.extract_strided_slice %4 {offsets = [0, 111], sizes = [4, 896], strides = [1, 1]} : vector<4x1792xf32> to vector<4x896xf32>
    %c52 = arith.constant 52 : index
    %c0_19 = arith.constant 0 : index
    %32 = vector.load %arg10[%c52, %c0_19] : memref<108x896xf32, #tpu.memory_space<vmem>>, vector<4x896xf32>
    tpu.vector_store %arg10[%c52, %c0_19], %31 {strides = array<i32>} : memref<108x896xf32, #tpu.memory_space<vmem>>, vector<4x896xf32>,
    %33 = vector.extract_strided_slice %4 {offsets = [0, 112], sizes = [4, 896], strides = [1, 1]} : vector<4x1792xf32> to vector<4x896xf32>
    %c56 = arith.constant 56 : index
    %c0_20 = arith.constant 0 : index
    %34 = vector.load %arg10[%c56, %c0_20] : memref<108x896xf32, #tpu.memory_space<vmem>>, vector<4x896xf32>
    tpu.vector_store %arg10[%c56, %c0_20], %33 {strides = array<i32>} : memref<108x896xf32, #tpu.memory_space<vmem>>, vector<4x896xf32>,
    %35 = vector.extract_strided_slice %4 {offsets = [0, 120], sizes = [4, 896], strides = [1, 1]} : vector<4x1792xf32> to vector<4x896xf32>
    %c60 = arith.constant 60 : index
    %c0_21 = arith.constant 0 : index
    %36 = vector.load %arg10[%c60, %c0_21] : memref<108x896xf32, #tpu.memory_space<vmem>>, vector<4x896xf32>
    tpu.vector_store %arg10[%c60, %c0_21], %35 {strides = array<i32>} : memref<108x896xf32, #tpu.memory_space<vmem>>, vector<4x896xf32>,
    %37 = vector.extract_strided_slice %4 {offsets = [0, 121], sizes = [4, 896], strides = [1, 1]} : vector<4x1792xf32> to vector<4x896xf32>
    %c64 = arith.constant 64 : index
    %c0_22 = arith.constant 0 : index
    %38 = vector.load %arg10[%c64, %c0_22] : memref<108x896xf32, #tpu.memory_space<vmem>>, vector<4x896xf32>
    tpu.vector_store %arg10[%c64, %c0_22], %37 {strides = array<i32>} : memref<108x896xf32, #tpu.memory_space<vmem>>, vector<4x896xf32>,
    %39 = vector.extract_strided_slice %4 {offsets = [0, 122], sizes = [4, 896], strides = [1, 1]} : vector<4x1792xf32> to vector<4x896xf32>
    %c68 = arith.constant 68 : index
    %c0_23 = arith.constant 0 : index
    %40 = vector.load %arg10[%c68, %c0_23] : memref<108x896xf32, #tpu.memory_space<vmem>>, vector<4x896xf32>
    tpu.vector_store %arg10[%c68, %c0_23], %39 {strides = array<i32>} : memref<108x896xf32, #tpu.memory_space<vmem>>, vector<4x896xf32>,
    %41 = vector.extract_strided_slice %4 {offsets = [0, 200], sizes = [4, 896], strides = [1, 1]} : vector<4x1792xf32> to vector<4x896xf32>
    %c72 = arith.constant 72 : index
    %c0_24 = arith.constant 0 : index
    %42 = vector.load %arg10[%c72, %c0_24] : memref<108x896xf32, #tpu.memory_space<vmem>>, vector<4x896xf32>
    tpu.vector_store %arg10[%c72, %c0_24], %41 {strides = array<i32>} : memref<108x896xf32, #tpu.memory_space<vmem>>, vector<4x896xf32>,
    %43 = vector.extract_strided_slice %4 {offsets = [0, 201], sizes = [4, 896], strides = [1, 1]} : vector<4x1792xf32> to vector<4x896xf32>
    %c76 = arith.constant 76 : index
    %c0_25 = arith.constant 0 : index
    %44 = vector.load %arg10[%c76, %c0_25] : memref<108x896xf32, #tpu.memory_space<vmem>>, vector<4x896xf32>
    tpu.vector_store %arg10[%c76, %c0_25], %43 {strides = array<i32>} : memref<108x896xf32, #tpu.memory_space<vmem>>, vector<4x896xf32>,
    %45 = vector.extract_strided_slice %4 {offsets = [0, 202], sizes = [4, 896], strides = [1, 1]} : vector<4x1792xf32> to vector<4x896xf32>
    %c80 = arith.constant 80 : index
    %c0_26 = arith.constant 0 : index
    %46 = vector.load %arg10[%c80, %c0_26] : memref<108x896xf32, #tpu.memory_space<vmem>>, vector<4x896xf32>
    tpu.vector_store %arg10[%c80, %c0_26], %45 {strides = array<i32>} : memref<108x896xf32, #tpu.memory_space<vmem>>, vector<4x896xf32>,
    %47 = vector.extract_strided_slice %4 {offsets = [0, 210], sizes = [4, 896], strides = [1, 1]} : vector<4x1792xf32> to vector<4x896xf32>
    %c84 = arith.constant 84 : index
    %c0_27 = arith.constant 0 : index
    %48 = vector.load %arg10[%c84, %c0_27] : memref<108x896xf32, #tpu.memory_space<vmem>>, vector<4x896xf32>
    tpu.vector_store %arg10[%c84, %c0_27], %47 {strides = array<i32>} : memref<108x896xf32, #tpu.memory_space<vmem>>, vector<4x896xf32>,
    %49 = vector.extract_strided_slice %4 {offsets = [0, 211], sizes = [4, 896], strides = [1, 1]} : vector<4x1792xf32> to vector<4x896xf32>
    %c88 = arith.constant 88 : index
    %c0_28 = arith.constant 0 : index
    %50 = vector.load %arg10[%c88, %c0_28] : memref<108x896xf32, #tpu.memory_space<vmem>>, vector<4x896xf32>
    tpu.vector_store %arg10[%c88, %c0_28], %49 {strides = array<i32>} : memref<108x896xf32, #tpu.memory_space<vmem>>, vector<4x896xf32>,
    %51 = vector.extract_strided_slice %4 {offsets = [0, 212], sizes = [4, 896], strides = [1, 1]} : vector<4x1792xf32> to vector<4x896xf32>
    %c92 = arith.constant 92 : index
    %c0_29 = arith.constant 0 : index
    %52 = vector.load %arg10[%c92, %c0_29] : memref<108x896xf32, #tpu.memory_space<vmem>>, vector<4x896xf32>
    tpu.vector_store %arg10[%c92, %c0_29], %51 {strides = array<i32>} : memref<108x896xf32, #tpu.memory_space<vmem>>, vector<4x896xf32>,
    %53 = vector.extract_strided_slice %4 {offsets = [0, 220], sizes = [4, 896], strides = [1, 1]} : vector<4x1792xf32> to vector<4x896xf32>
    %c96 = arith.constant 96 : index
    %c0_30 = arith.constant 0 : index
    %54 = vector.load %arg10[%c96, %c0_30] : memref<108x896xf32, #tpu.memory_space<vmem>>, vector<4x896xf32>
    tpu.vector_store %arg10[%c96, %c0_30], %53 {strides = array<i32>} : memref<108x896xf32, #tpu.memory_space<vmem>>, vector<4x896xf32>,
    %55 = vector.extract_strided_slice %4 {offsets = [0, 221], sizes = [4, 896], strides = [1, 1]} : vector<4x1792xf32> to vector<4x896xf32>
    %c100 = arith.constant 100 : index
    %c0_31 = arith.constant 0 : index
    %56 = vector.load %arg10[%c100, %c0_31] : memref<108x896xf32, #tpu.memory_space<vmem>>, vector<4x896xf32>
    tpu.vector_store %arg10[%c100, %c0_31], %55 {strides = array<i32>} : memref<108x896xf32, #tpu.memory_space<vmem>>, vector<4x896xf32>,
    %57 = vector.extract_strided_slice %4 {offsets = [0, 222], sizes = [4, 896], strides = [1, 1]} : vector<4x1792xf32> to vector<4x896xf32>
    %c104 = arith.constant 104 : index
    %c0_32 = arith.constant 0 : index
    %58 = vector.load %arg10[%c104, %c0_32] : memref<108x896xf32, #tpu.memory_space<vmem>>, vector<4x896xf32>
    tpu.vector_store %arg10[%c104, %c0_32], %57 {strides = array<i32>} : memref<108x896xf32, #tpu.memory_space<vmem>>, vector<4x896xf32>,
    %c0_33 = arith.constant 0 : index
    %c0_34 = arith.constant 0 : index
    %59 = vector.load %arg4[%c0_33, %c0_34] : memref<8x108xf32, #tpu.memory_space<vmem>>, vector<8x108xf32>
    %c0_35 = arith.constant 0 : index
    %c0_36 = arith.constant 0 : index
    %60 = vector.load %arg10[%c0_35, %c0_36] : memref<108x896xf32, #tpu.memory_space<vmem>>, vector<108x896xf32>
    %cst = arith.constant dense<0.000000e+00> : vector<8x896xf32>
    %61 = tpu.matmul %59, %60, %cst {dimension_numbers = #tpu.dot_dimension_numbers<[1], [0], [0], [1], [0, 0, 1, 1], [], []>} : vector<8x108xf32>, vector<108x896xf32>, vector<8x896xf32> -> vector<8x896xf32>
    %c0_37 = arith.constant 0 : index
    %c0_38 = arith.constant 0 : index
    %62 = vector.load %arg5[%c0_37, %c0_38] : memref<8x1xf32, #tpu.memory_space<vmem>>, vector<8x1xf32>
    %63 = vector.broadcast %62 : vector<8x1xf32> to vector<8x896xf32>
    %64 = arith.addf %61, %63 : vector<8x896xf32>
    %c896_i32 = arith.constant 896 : i32
    %65 = arith.muli %arg1, %c896_i32 : i32
    %66 = tpu.assume_multiple %65, 128 : i32
    %c0_39 = arith.constant 0 : index
    %c0_40 = arith.constant 0 : index
    %67 = arith.index_cast %66 : i32 to index
    %68 = vector.load %arg9[%c0_39, %c0_40, %67] : memref<1x8x896xf32, #tpu.memory_space<vmem>>, vector<1x8x896xf32>
    %69 = vector.shape_cast %68 : vector<1x8x896xf32> to vector<8x896xf32>
    %70 = vector.shape_cast %64 : vector<8x896xf32> to vector<1x8x896xf32>
    tpu.vector_store %arg9[%c0_39, %c0_40, %67], %70 {strides = array<i32>} : memref<1x8x896xf32, #tpu.memory_space<vmem>>, vector<1x8x896xf32>,
    %c0_i32 = arith.constant 0 : i32
    %71 = arith.cmpi eq, %arg1, %c0_i32 : i32
    %72 = arith.extui %71 : i1 to i32
    %c0_i32_41 = arith.constant 0 : i32
    %73 = arith.cmpi ne, %72, %c0_i32_41 : i32
    scf.if %73 {
      %c0_42 = arith.constant 0 : index
      %c0_43 = arith.constant 0 : index
      %c0_44 = arith.constant 0 : index
      %74 = vector.load %arg9[%c0_42, %c0_43, %c0_44] : memref<1x8x896xf32, #tpu.memory_space<vmem>>, vector<1x8x896xf32>
      %75 = vector.shape_cast %74 : vector<1x8x896xf32> to vector<8x896xf32>
      %c0_45 = arith.constant 0 : index
      %c0_46 = arith.constant 0 : index
      %76 = vector.load %arg6[%c0_45, %c0_46] : memref<1x896xf32, #tpu.memory_space<vmem>>, vector<1x896xf32>
      %cst_47 = arith.constant 0.000000e+00 : f32
      %77 = vector.broadcast %cst_47 : f32 to vector<1x896xf32>
      %78 = arith.cmpf ogt, %76, %77 : vector<1x896xf32>
      %cst_48 = arith.constant 0.000000e+00 : f32
      %79 = vector.shape_cast %78 : vector<1x896xi1> to vector<1x896xi1>
      %80 = vector.broadcast %79 : vector<1x896xi1> to vector<8x896xi1>
      %81 = vector.broadcast %cst_48 : f32 to vector<8x896xf32>
      %82 = arith.select %80, %75, %81 : vector<8x896xi1>, vector<8x896xf32>
      %cst_49 = arith.constant dense<0.000000e+00> : vector<8xf32>
      %83 = vector.multi_reduction <add>, %82, %cst_49 [1] : vector<8x896xf32> to vector<8xf32>
      %84 = vector.shape_cast %83 : vector<8xf32> to vector<8x1xf32>
      %cst_50 = arith.constant 0.001953125 : f32
      %85 = vector.broadcast %cst_50 : f32 to vector<8x1xf32>
      %86 = arith.mulf %84, %85 : vector<8x1xf32>
      %cst_51 = arith.constant 0.000000e+00 : f32
      %87 = vector.broadcast %cst_51 : f32 to vector<1x896xf32>
      %88 = arith.cmpf ogt, %76, %87 : vector<1x896xf32>
      %89 = vector.broadcast %86 : vector<8x1xf32> to vector<8x896xf32>
      %90 = arith.subf %75, %89 : vector<8x896xf32>
      %cst_52 = arith.constant 0.000000e+00 : f32
      %91 = vector.shape_cast %88 : vector<1x896xi1> to vector<1x896xi1>
      %92 = vector.broadcast %91 : vector<1x896xi1> to vector<8x896xi1>
      %93 = vector.broadcast %cst_52 : f32 to vector<8x896xf32>
      %94 = arith.select %92, %90, %93 : vector<8x896xi1>, vector<8x896xf32>
      %95 = arith.mulf %94, %94 : vector<8x896xf32>
      %cst_53 = arith.constant dense<0.000000e+00> : vector<8xf32>
      %96 = vector.multi_reduction <add>, %95, %cst_53 [1] : vector<8x896xf32> to vector<8xf32>
      %97 = vector.shape_cast %96 : vector<8xf32> to vector<8x1xf32>
      %cst_54 = arith.constant 0.001953125 : f32
      %98 = vector.broadcast %cst_54 : f32 to vector<8x1xf32>
      %99 = arith.mulf %97, %98 : vector<8x1xf32>
      %cst_55 = arith.constant 9.99999974E-6 : f32
      %100 = vector.broadcast %cst_55 : f32 to vector<8x1xf32>
      %101 = arith.addf %99, %100 : vector<8x1xf32>
      %102 = math.rsqrt %101 : vector<8x1xf32>
      %c0_56 = arith.constant 0 : index
      %c0_57 = arith.constant 0 : index
      %103 = vector.load %arg7[%c0_56, %c0_57] : memref<8x1xf32, #tpu.memory_space<vmem>>, vector<8x1xf32>
      %104 = arith.mulf %103, %102 : vector<8x1xf32>
      %c0_58 = arith.constant 0 : index
      %c0_59 = arith.constant 0 : index
      %105 = vector.load %arg8[%c0_58, %c0_59] : memref<8x1xf32, #tpu.memory_space<vmem>>, vector<8x1xf32>
      %106 = arith.mulf %86, %104 : vector<8x1xf32>
      %107 = arith.subf %105, %106 : vector<8x1xf32>
      %108 = vector.broadcast %104 : vector<8x1xf32> to vector<8x896xf32>
      %109 = arith.mulf %75, %108 : vector<8x896xf32>
      %110 = vector.broadcast %107 : vector<8x1xf32> to vector<8x896xf32>
      %111 = arith.addf %109, %110 : vector<8x896xf32>
      %cst_60 = arith.constant 0.000000e+00 : f32
      %112 = vector.broadcast %cst_60 : f32 to vector<8x896xf32>
      %113 = arith.cmpf oge, %111, %112 : vector<8x896xf32>
      %cst_61 = arith.constant 0.00999999977 : f32
      %114 = vector.broadcast %cst_61 : f32 to vector<8x896xf32>
      %115 = arith.mulf %114, %111 : vector<8x896xf32>
      %116 = arith.select %113, %111, %115 : vector<8x896xi1>, vector<8x896xf32>
      %c0_62 = arith.constant 0 : index
      %c0_63 = arith.constant 0 : index
      %c0_64 = arith.constant 0 : index
      %117 = vector.load %arg9[%c0_62, %c0_63, %c0_64] : memref<1x8x896xf32, #tpu.memory_space<vmem>>, vector<1x8x896xf32>
      %118 = vector.shape_cast %117 : vector<1x8x896xf32> to vector<8x896xf32>
      %119 = vector.shape_cast %116 : vector<8x896xf32> to vector<1x8x896xf32>
      tpu.vector_store %arg9[%c0_62, %c0_63, %c0_64], %119 {strides = array<i32>} : memref<1x8x896xf32, #tpu.memory_space<vmem>>, vector<1x8x896xf32>,
    } else {
    }
    return
  }
  func.func @transform_0(%arg0: i32, %arg1: i32) -> (i32, i32, i32) {
    %c0_i32 = arith.constant 0 : i32
    %0 = arith.addi %arg1, %c0_i32 : i32
    %c0_i32_0 = arith.constant 0 : i32
    %c0_i32_1 = arith.constant 0 : i32
    return %arg0, %c0_i32_0, %0 : i32, i32, i32
  }
  func.func @transform_1(%arg0: i32, %arg1: i32) -> (i32, i32, i32) {
    %c1_i32 = arith.constant 1 : i32
    %0 = arith.addi %arg1, %c1_i32 : i32
    %c0_i32 = arith.constant 0 : i32
    %c0_i32_0 = arith.constant 0 : i32
    return %arg0, %c0_i32, %0 : i32, i32, i32
  }
  func.func @transform_2(%arg0: i32, %arg1: i32) -> (i32, i32) {
    %c0_i32 = arith.constant 0 : i32
    %c0_i32_0 = arith.constant 0 : i32
    %c0_i32_1 = arith.constant 0 : i32
    return %c0_i32, %c0_i32_0 : i32, i32
  }
  func.func @transform_3(%arg0: i32, %arg1: i32) -> (i32, i32) {
    %c0_i32 = arith.constant 0 : i32
    %c0_i32_0 = arith.constant 0 : i32
    %c0_i32_1 = arith.constant 0 : i32
    return %c0_i32, %c0_i32_0 : i32, i32
  }
  func.func @transform_4(%arg0: i32, %arg1: i32) -> (i32, i32) {
    %c0_i32 = arith.constant 0 : i32
    %c0_i32_0 = arith.constant 0 : i32
    %c0_i32_1 = arith.constant 0 : i32
    return %c0_i32, %c0_i32_0 : i32, i32
  }
  func.func @transform_5(%arg0: i32, %arg1: i32) -> (i32, i32) {
    %c0_i32 = arith.constant 0 : i32
    %c0_i32_0 = arith.constant 0 : i32
    %c0_i32_1 = arith.constant 0 : i32
    return %c0_i32, %c0_i32_0 : i32, i32
  }
  func.func @transform_6(%arg0: i32, %arg1: i32) -> (i32, i32) {
    %c0_i32 = arith.constant 0 : i32
    %c0_i32_0 = arith.constant 0 : i32
    %c0_i32_1 = arith.constant 0 : i32
    return %c0_i32, %c0_i32_0 : i32, i32
  }
  func.func @transform_7(%arg0: i32, %arg1: i32) -> (i32, i32, i32) {
    %c0_i32 = arith.constant 0 : i32
    %c0_i32_0 = arith.constant 0 : i32
    %c0_i32_1 = arith.constant 0 : i32
    return %arg0, %c0_i32, %c0_i32_0 : i32, i32, i32
  }
}

</mosaic_0001>

<bundles_post_ra>
// kernel: decoder_block_forward.1
= control target key start
LH: loop header
LB: loop body
LE: loop exit
PB: predicated region body
PF: predicated region fallthrough
CT: control target
= control target key end

     0   :  { %s4231_s0 = inlined_call_operand.hbm [shape: f32[2,4,1800], index: 0, kind: input, shape index: {}, may-alias: {0,1}]   ;;  %s4232_s1 = inlined_call_operand.hbm [shape: f32[2,4,1800], index: 1, kind: input, shape index: {}, may-alias: {0,1}]   ;;  %s4233_s2 = inlined_call_operand.hbm [shape: f32[8,108], index: 2, kind: input, shape index: {}]   ;;  %s4234_s3 = inlined_call_operand.hbm [shape: f32[8,1], index: 3, kind: input, shape index: {}]   ;;  %s4235_s4 = inlined_call_operand.hbm [shape: f32[1,896], index: 4, kind: input, shape index: {}]   ;;  %s4236_s5 = inlined_call_operand.hbm [shape: f32[8,1], index: 5, kind: input, shape index: {}]   ;;  %s4237_s6 = inlined_call_operand.hbm [shape: f32[8,1], index: 6, kind: input, shape index: {}]   ;;  %s4238_s7 = inlined_call_operand.hbm [shape: f32[2,8,896], index: 7, kind: output, shape index: {}]  }
   0x1   :  { %4277 = sst [smem:[#allocation22_spill]] %s4231_s0 }
   0x2   :  { %4278 = sst [smem:[#allocation23_spill]] %s4233_s2 }
   0x3   :  { %4279 = sst [smem:[#allocation24_spill]] %s4234_s3 }
   0x4   :  { %4280 = sst [smem:[#allocation25_spill]] %s4235_s4 }
   0x5   :  { %4281 = sst [smem:[#allocation26_spill]] %s4236_s5 }
   0x6   :  { %12 = vsyncpa [#allocation4], 0 }
   0x7   :  { %14 = vsyncpa [#allocation4 + $0x1], 0 }
   0x8   :  { %15 = vsyncpa [#allocation7], 0 }
   0x9   :  { %17 = vsyncpa [#allocation7 + $0x1], 0 }
   0xa   :  { %18 = vsyncpa [#allocation10], 0 }
   0xb   :  { %19 = vsyncpa [#allocation13], 0 }
   0xc   :  { %20 = vsyncpa [#allocation5], 0 }
   0xd   :  { %22 = vsyncpa [#allocation5 + $0x1], 0  ;;  %s2945_s24 = smov 0   ;;  %s2947_s25 = smov 0  }
   0xe   :  { %s2949_s26 = smov 0   ;;  %s2951_s27 = smov 0  }
   0xf   :  { %s2953_s28 = smov 0   ;;  %s2955_s29 = smov 0  }
  0x10 LB: > { %s2976_s30 = sadd.s32 4294967295, %s2864_s29   ;;  %p2215_p0 = scmp.ge.s32.totalorder %s2864_s29, 1  ;;  %s2864_s29 = sphi %s2955_s29, %s28_s29   ;;  %s2860_s28 = sphi %s2953_s28, %s4364_s28   ;;  %s2856_s27 = sphi %s2951_s27, %s4363_s27   ;;  %s2852_s26 = sphi %s2949_s26, %s4362_s26   ;;  %s2848_s25 = sphi %s2947_s25, %s4361_s25   ;;  %s2844_s24 = sphi %s2945_s24, %s4360_s24  }
  0x11   : > { %p4239_p1 = scmp.eq.s32.totalorder %s2976_s30, 0  ;;  %p234_p2 = scmp.lt.s32.totalorder %s2864_s29, 3 }
  0x12   : > { %s2866_s9 = smov [#allocation8]   ;;  %s2867_s11 = smov [#allocation9]  }
  0x13   : > { %p2981_p3 = pnand %p2215_p0, %p234_p2  ;;  %s247_s10 = sshll.u32 %s2866_s9, 4  ;;  %s248_s10 = int_to_ptr.vmem [resolvable:$true] %s247_s10 }
  0x14   : > { %s258_s12 = sshll.u32 %s2867_s11, 4  ;;  %s2868_s14 = smov [#allocation12]   ;;  %s2994_s12 = int_to_ptr.vmem [resolvable:$true] %s258_s12 }
  0x15   : > { %s4282_s8 = scalar_select %p2981_p3, 1, 0 }
  0x16   : > { %p2434_p5 = pneg %p2981_p3  ;;  %s280_s15 = sshll.u32 %s2868_s14, 4  ;;  %s2996_s15 = int_to_ptr.vmem [resolvable:$true] %s280_s15 }
  0x17   : > { %s4284_s2 = sld [smem:[#allocation23_spill]] }
  0x18   : > { %p2990_p6 = pnand %p2434_p5, %p4239_p1 }
  0x1a   : > { %p3006_p8 = pneg %p2990_p6 }
  0x1d   : > { %s2565_s18 = scalar_lea.hbm %s4284_s2, 128 }
  0x1e   : > { %p2566_p7 = scmp.ne.s32.totalorder %s4284_s2, %s2565_s18  ;;  %p2572_p11 = scmp.lt.u32.totalorder %s2565_s18, %s4284_s2 }
  0x20   : > { %p2568_p9 = pnand %p3006_p8, %p2566_p7 }
  0x22   : > { %p2569_p10 = pneg %p2568_p9 }
  0x24   : > { %p2574_p12 = pnand %p2572_p11, %p2569_p10 }
  0x26   : > { %2577 = shalt.err (!%p2574_p12)
}
  0x27   : > { %s2578_s9 = scalar_lea.vmem %s248_s10, 128  ;;  %p2586_p5 = scmp.lt.s32.totalorder %s248_s10, %s248_s10 }
  0x28   : > { %p2579_p13 = scmp.ne.s32.totalorder %s248_s10, %s2578_s9  ;;  %p2587_p4 = scmp.lt.s32.totalorder %s2578_s9, %s2578_s9 }
  0x2a   : > { %p2581_p0 = pnand %p2579_p13, %p3006_p8  ;;  %p2588_p1 = por %p2587_p4, %p2586_p5 }
  0x2c   : > { %p2582_p2 = pneg %p2581_p0 }
  0x2e   : > { %p2589_p3 = pnand %p2588_p1, %p2582_p2 }
  0x30   : > { %2592 = shalt.err (!%p2589_p3)
}
  0x31   : > { %2437 = dma.hbm_to_vmem [thread:$0]  (!%p2990_p6), %s4284_s2, 128, %s248_s10, [#allocation7]  }
  0x32   : > { %s4286_s3 = sld [smem:[#allocation24_spill]] }
  0x38   : > { %s2593_s18 = scalar_lea.hbm %s4286_s3, 128 }
  0x39   : > { %p2594_p7 = scmp.ne.s32.totalorder %s4286_s3, %s2593_s18  ;;  %p2600_p1 = scmp.lt.u32.totalorder %s2593_s18, %s4286_s3 }
  0x3b   : > { %p2596_p9 = pnand %p2594_p7, %p3006_p8 }
  0x3d   : > { %p2597_p4 = pneg %p2596_p9 }
  0x3f   : > { %p2602_p3 = pnand %p2600_p1, %p2597_p4 }
  0x41   : > { %2605 = shalt.err (!%p2602_p3)
}
  0x42   : > { %s2606_s10 = scalar_lea.vmem %s2994_s12, 128  ;;  %p2614_p13 = scmp.lt.s32.totalorder %s2994_s12, %s2994_s12 }
  0x43   : > { %p2607_p10 = scmp.ne.s32.totalorder %s2994_s12, %s2606_s10  ;;  %p2615_p0 = scmp.lt.s32.totalorder %s2606_s10, %s2606_s10 }
  0x45   : > { %p2609_p11 = pnand %p2607_p10, %p3006_p8  ;;  %p2616_p2 = por %p2615_p0, %p2614_p13 }
  0x47   : > { %p2610_p12 = pneg %p2609_p11 }
  0x49   : > { %p2617_p5 = pnand %p2616_p2, %p2610_p12 }
  0x4b   : > { %2620 = shalt.err (!%p2617_p5)
}
  0x4c   : > { %2440 = dma.hbm_to_vmem [thread:$0]  (!%p2990_p6), %s4286_s3, 128, %s2994_s12, [#allocation10]  }
  0x4d   : > { %s4287_s5 = sld [smem:[#allocation26_spill]] }
  0x53   : > { %s2621_s17 = scalar_lea.hbm %s4287_s5, 128 }
  0x54   : > { %p2622_p7 = scmp.ne.s32.totalorder %s4287_s5, %s2621_s17  ;;  %p2628_p1 = scmp.lt.u32.totalorder %s2621_s17, %s4287_s5 }
  0x56   : > { %p2624_p9 = pnand %p2622_p7, %p3006_p8 }
  0x58   : > { %p2625_p4 = pneg %p2624_p9 }
  0x5a   : > { %p2630_p3 = pnand %p2628_p1, %p2625_p4 }
  0x5c   : > { %2633 = shalt.err (!%p2630_p3)
}
  0x5d   : > { %s2634_s12 = scalar_lea.vmem %s2996_s15, 128  ;;  %p2642_p13 = scmp.lt.s32.totalorder %s2996_s15, %s2996_s15 }
  0x5e   : > { %p2635_p10 = scmp.ne.s32.totalorder %s2996_s15, %s2634_s12  ;;  %p2643_p0 = scmp.lt.s32.totalorder %s2634_s12, %s2634_s12 }
  0x60   : > { %p2637_p11 = pnand %p2635_p10, %p3006_p8  ;;  %p2644_p2 = por %p2643_p0, %p2642_p13 }
  0x62   : > { %p2638_p12 = pneg %p2637_p11 }
  0x64   : > { %p2645_p5 = pnand %p2644_p2, %p2638_p12 }
  0x66   : > { %2648 = shalt.err (!%p2645_p5)
}
  0x67   : > { %2446 = dma.hbm_to_vmem [thread:$0]  (!%p2990_p6), %s4287_s5, 128, %s2996_s15, [#allocation13]  }
  0x68   : > { %s2869_s9 = smov [#allocation11]   ;;  %s2870_s14 = smov [#allocation14]  }
  0x69   : > { %s269_s11 = sshll.u32 %s2869_s9, 4  ;;  %s291_s16 = sshll.u32 %s2870_s14, 4  ;;  %s270_s11 = int_to_ptr.vmem [resolvable:$true] %s269_s11  ;;  %s292_s16 = int_to_ptr.vmem [resolvable:$true] %s291_s16 }
  0x6a   : > { %s4288_s4 = sld [smem:[#allocation25_spill]] }
  0x70   : > { %s2649_s19 = scalar_lea.hbm %s4288_s4, 112 }
  0x71   : > { %p2650_p7 = scmp.ne.s32.totalorder %s4288_s4, %s2649_s19  ;;  %p2656_p1 = scmp.lt.u32.totalorder %s2649_s19, %s4288_s4 }
  0x73   : > { %p2652_p9 = pnand %p2650_p7, %p3006_p8 }
  0x75   : > { %p2653_p4 = pneg %p2652_p9 }
  0x77   : > { %p2658_p3 = pnand %p2656_p1, %p2653_p4 }
  0x79   : > { %2661 = shalt.err (!%p2658_p3)
}
  0x7a   : > { %s2662_s15 = scalar_lea.vmem %s270_s11, 112  ;;  %s2669_s10 = scalar_lea.vmem %s270_s11, 128 }
  0x7b   : > { %p2663_p10 = scmp.ne.s32.totalorder %s270_s11, %s2662_s15  ;;  %p2670_p13 = scmp.lt.s32.totalorder %s270_s11, %s270_s11 }
  0x7c   : > { %p2671_p0 = scmp.lt.s32.totalorder %s2669_s10, %s2662_s15 }
  0x7d   : > { %p2665_p11 = pnand %p2663_p10, %p3006_p8 }
  0x7e   : > { %p2672_p2 = por %p2671_p0, %p2670_p13 }
  0x7f   : > { %p2666_p12 = pneg %p2665_p11 }
  0x81   : > { %p2673_p5 = pnand %p2672_p2, %p2666_p12 }
  0x83   : > { %2676 = shalt.err (!%p2673_p5)
}
  0x84   : > { %2443 = dma.hbm_to_vmem [thread:$0]  (!%p2990_p6), %s4288_s4, 112, %s270_s11, [#allocation10]  }
  0x85   : > { %s2677_s19 = scalar_lea.hbm %s4237_s6, 128 }
  0x86   : > { %p2678_p7 = scmp.ne.s32.totalorder %s4237_s6, %s2677_s19  ;;  %p2684_p1 = scmp.lt.u32.totalorder %s2677_s19, %s4237_s6 }
  0x88   : > { %p2680_p9 = pnand %p2678_p7, %p3006_p8 }
  0x8a   : > { %p2681_p4 = pneg %p2680_p9 }
  0x8c   : > { %p2686_p3 = pnand %p2684_p1, %p2681_p4 }
  0x8e   : > { %2689 = shalt.err (!%p2686_p3)
}
  0x8f   : > { %s2690_s15 = scalar_lea.vmem %s292_s16, 128  ;;  %p2698_p13 = scmp.lt.s32.totalorder %s292_s16, %s292_s16 }
  0x90   : > { %p2691_p10 = scmp.ne.s32.totalorder %s292_s16, %s2690_s15  ;;  %p2699_p0 = scmp.lt.s32.totalorder %s2690_s15, %s2690_s15 }
  0x92   : > { %p2693_p11 = pnand %p2691_p10, %p3006_p8  ;;  %p2700_p2 = por %p2699_p0, %p2698_p13 }
  0x94   : > { %p2694_p12 = pneg %p2693_p11 }
  0x96   : > { %p2701_p5 = pnand %p2700_p2, %p2694_p12 }
  0x98   : > { %2704 = shalt.err (!%p2701_p5)
}
  0x99   : > { %2449 = dma.hbm_to_vmem [thread:$0]  (!%p2990_p6), %s4237_s6, 128, %s292_s16, [#allocation13]  }
  0x9a   : > { %s2214_s21 = sadd.s32 4294967294, %s2864_s29   ;;  %s40_s9 = sadd.s32 1, %s2860_s28 }
  0x9b   : > { %s49_s13 = sadd.s32 1, %s2852_s26  ;;  %p42_p8 = scmp.ge.s32.totalorder %s40_s9, 2 }
  0x9c   : > { %p56_p7 = scmp.ne.s32.totalorder %s2852_s26, %s2848_s25  ;;  %p57_p9 = scmp.eq.s32.totalorder %s2864_s29, 0 }
  0x9d   : > { %p62_p4 = scmp.ne.s32.totalorder %s2848_s25, %s2844_s24  ;;  %s4366_s9 = smov (%p42_p8, %s40_s9), 0 }
  0x9e   : > { %p3114_p1 = por %p57_p9, %p56_p7  ;;  %p4290_p6 = scmp.eq.s32.totalorder %s2976_s30, 0 }
  0x9f   : > { %s44_s17 = ssub.s32 %s2860_s28, %s4366_s9  ;;  %p221_p10 = scmp.eq.s32.totalorder %s2976_s30, 1 }
  0xa0   : > { %p3120_p3 = por %p4290_p6, %p62_p4  ;;  %p47_p11 = scmp.eq.s32.totalorder %s44_s17, 0 }
  0xa1   : > { %p227_p12 = scmp.eq.s32.totalorder %s2214_s21, 1  ;;  %p3127_p13 = por %p221_p10, %p56_p7 }
  0xa2   : > { %s4291_s16 = scalar_select %p3120_p3, 1, 0 }
  0xa3   : > { %s4292_s18 = scalar_select %p3127_p13, 1, 0 }
  0xa4   : > { %p2466_p0 = scmp.lt.s32.totalorder %s2864_s29, 2  ;;  %p3135_p2 = por %p227_p12, %p62_p4 }
  0xa5   : > { %s3133_s19 = scalar_select %p47_p11, %s2852_s26, %s49_s13  }
  0xa6   : > { %s4293_s20 = scalar_select %p3135_p2, 1, 0 }
  0xa7   : > { %s302_s22 = sand.u32 1, %s2852_s26   ;;  %s4241_s23 = smul.u32 960, %s2860_s28 }
  0xa8   : > { %s3140_s12 = smul.u32 28, %s302_s22  ;;  %p3145_p5 = pnand %p2466_p0, %p3114_p1 }
  0xa9   : > { %s4295_s0 = sld [smem:[#allocation22_spill]]  ;;  %s303_s14 = scalar_lea.sflag [#allocation4], %s302_s22 }
  0xaa   : > { %s306_s17 = scalar_lea.vmem [#allocation3], %s3140_s12  ;;  %p2707_p7 = pneg %p3145_p5 }
  0xab   : > { %s322_s2 = sshll.u32 %s306_s17, 4  ;;  %s3158_s2 = int_to_ptr.vmem [resolvable:$true] %s322_s2 }
  0xaf   : > { %s3155_s13 = scalar_lea.hbm %s4295_s0, %s4241_s23  ;;  %s2710_s11 = scalar_lea.hbm %s4295_s0, 1920 }
  0xb0   : > { %s2705_s3 = scalar_lea.hbm %s3155_s13, 448  ;;  %p2711_p1 = scmp.lt.u32.totalorder %s3155_s13, %s4295_s0 }
  0xb1   : > { %p2706_p8 = scmp.ne.s32.totalorder %s3155_s13, %s2705_s3  ;;  %p2712_p6 = scmp.lt.u32.totalorder %s2710_s11, %s2705_s3 }
  0xb2   : > { %p2714_p11 = scmp.lt.u32.totalorder %s2705_s3, %s3155_s13 }
  0xb3   : > { %p2708_p9 = pnand %p2707_p7, %p2706_p8  ;;  %p2713_p10 = por %p2712_p6, %p2711_p1 }
  0xb5   : > { %p2709_p4 = pneg %p2708_p9  ;;  %p2715_p12 = por %p2714_p11, %p2713_p10 }
  0xb7   : > { %p2716_p0 = pnand %p2715_p12, %p2709_p4 }
  0xb9   : > { %2719 = shalt.err (!%p2716_p0)
}
  0xba   : > { %s2720_s22 = scalar_lea.vmem %s3158_s2, 448  ;;  %s2871_s17 = smov [#allocation3]  }
  0xbb   : > { %p2721_p8 = scmp.ne.s32.totalorder %s3158_s2, %s2720_s22  ;;  %s2725_s10 = sshll.u32 %s2871_s17, 4  ;;  %s2726_s10 = int_to_ptr.vmem [resolvable:$false] %s2725_s10 }
  0xbc   : > { %s2727_s4 = scalar_lea.vmem %s2726_s10, 896  ;;  %p2728_p13 = scmp.lt.s32.totalorder %s3158_s2, %s2726_s10 }
  0xbd   : > { %p2723_p9 = pnand %p2721_p8, %p2707_p7  ;;  %p2729_p1 = scmp.lt.s32.totalorder %s2727_s4, %s2720_s22 }
  0xbf   : > { %p2724_p2 = pneg %p2723_p9  ;;  %p2730_p6 = por %p2729_p1, %p2728_p13 }
  0xc1   : > { %p2731_p10 = pnand %p2730_p6, %p2724_p2 }
  0xc3   : > { %2734 = shalt.err (!%p2731_p10)
}
  0xc4   : > { %2453 = dma.hbm_to_vmem [thread:$0]  (!%p3145_p5), %s3155_s13, 448, %s3158_s2, %s303_s14  }
  0xc5   : > { %s4296_s3 = smul.u32 960, %s2860_s28  ;;  %s333_s17 = scalar_lea.vmem [#allocation6], %s3140_s12 }
  0xc6   : > { %s350_s10 = sshll.u32 %s333_s17, 4  ;;  %s4297_s4 = sand.u32 1, %s2864_s29   ;;  %s351_s10 = int_to_ptr.vmem [resolvable:$true] %s350_s10 }
  0xc7   : > { %s2100_s21 = scalar_lea.hbm %s4232_s1, %s4296_s3  ;;  %s330_s0 = scalar_lea.sflag [#allocation7], %s4297_s4 }
  0xc8   : > { %s3191_s22 = scalar_lea.hbm %s2100_s21, 448  ;;  %s2765_s5 = scalar_lea.hbm %s2100_s21, 896 }
  0xc9   : > { %p2736_p13 = scmp.ne.s32.totalorder %s3191_s22, %s2765_s5  ;;  %s2740_s14 = scalar_lea.hbm %s4232_s1, 1920 }
  0xca   : > { %p2741_p11 = scmp.lt.u32.totalorder %s3191_s22, %s4232_s1  ;;  %p2742_p12 = scmp.lt.u32.totalorder %s2740_s14, %s2765_s5 }
  0xcb   : > { %p2738_p2 = pnand %p2736_p13, %p2707_p7  ;;  %p2744_p8 = scmp.lt.u32.totalorder %s2765_s5, %s3191_s22 }
  0xcc   : > { %p2743_p0 = por %p2742_p12, %p2741_p11 }
  0xcd   : > { %p2739_p4 = pneg %p2738_p2 }
  0xce   : > { %p2745_p9 = por %p2744_p8, %p2743_p0 }
  0xd0   : > { %p2746_p1 = pnand %p2745_p9, %p2739_p4 }
  0xd2   : > { %2749 = shalt.err (!%p2746_p1)
}
  0xd3   : > { %s2750_s23 = scalar_lea.vmem %s351_s10, 448  ;;  %s2872_s11 = smov [#allocation6]  }
  0xd4   : > { %p2751_p6 = scmp.ne.s32.totalorder %s351_s10, %s2750_s23  ;;  %s2755_s21 = sshll.u32 %s2872_s11, 4  ;;  %s2756_s21 = int_to_ptr.vmem [resolvable:$false] %s2755_s21 }
  0xd5   : > { %s2757_s17 = scalar_lea.vmem %s2756_s21, 896  ;;  %p2758_p2 = scmp.lt.s32.totalorder %s351_s10, %s2756_s21 }
  0xd6   : > { %p2753_p10 = pnand %p2751_p6, %p2707_p7  ;;  %p2759_p3 = scmp.lt.s32.totalorder %s2757_s17, %s2750_s23 }
  0xd8   : > { %p2754_p13 = pneg %p2753_p10  ;;  %p2760_p11 = por %p2759_p3, %p2758_p2 }
  0xda   : > { %p2761_p12 = pnand %p2760_p11, %p2754_p13 }
  0xdc   : > { %2764 = shalt.err (!%p2761_p12)
}
  0xdd   : > { %2456 = dma.hbm_to_vmem [thread:$0]  (!%p3145_p5), %s3191_s22, 448, %s351_s10, %s330_s0  }
  0xde   : > { %p4298_p4 = scmp.ne.s32.totalorder %s4282_s8, 0 }
  0xdf   : > { %s3216_s5 = sand.u32 (!%p4298_p4), 1, %s2848_s25   ;;  %p4299_p3 = scmp.ne.s32.totalorder (!%p4298_p4), %s4291_s16, 0 }
  0xe0   : > { %359 = sbr.rel (%p4298_p4) target bundleno = 1480 (0x5c8), region = 48  ;;  %s362_s2 = scalar_lea.sflag (!%p4298_p4), [#allocation4], %s3216_s5 }
  0xe1   : > { %s2405_s4 = smul.u32 (!%p4298_p4), 28, %s3216_s5 }
  0xe3   : > { %s3220_s13 = scalar_lea.vmem (!%p4298_p4), [#allocation3], %s2405_s4 }
  0xe7   : > { %2819 = dma.done.wait (%p4299_p3), %s362_s2, 448  }
  0xe8   : > { %2821 = vsyncadd (%p4299_p3), %s362_s2, 4294966848  ;;  %s370_s0 = sand.u32 1, %s2976_s30   ;;  %s3227_s15 = scalar_lea.vmem [#allocation6], %s2405_s4 }
  0xe9   : > { %s371_s8 = scalar_lea.sflag [#allocation7], %s370_s0 }
  0xea   : > { %2823 = dma.done.wait (%p4299_p3), %s371_s8, 448  }
  0xeb   : > { %2825 = vsyncadd (%p4299_p3), %s371_s8, 4294966848  ;;  %p4300_p5 = scmp.eq.s32.totalorder %s2976_s30, 0 }
  0xed   : > { %2827 = dma.done.wait (%p4300_p5), [#allocation7], 128   ;;  %p4301_p7 = pmov %p4300_p5 }
  0xee   : > { %p4302_p0 = pmov %p4300_p5 }
  0xef   : > { %2829 = vsyncadd (%p4301_p7), [#allocation7], 4294967168 }
  0xf0   : > { %2831 = dma.done.wait (%p4302_p0), [#allocation10], 240   ;;  %p4303_p8 = pmov %p4302_p0 }
  0xf1   : > { %p4304_p9 = pmov %p4302_p0 }
  0xf2   : > { %2833 = vsyncadd (%p4303_p8), [#allocation10], 4294967056 }
  0xf3   : > { %2835 = dma.done.wait (%p4304_p9), [#allocation13], 256   ;;  %p4305_p1 = pmov %p4302_p0 }
  0xf4   : > { %v3246_v0 = vld [vmem:[%s3220_s13 + $0x8] sm:$0xff]  ;;  %v3249_v1 = vld [vmem:[%s3220_s13] sm:$0xff]  ;;  %v3252_v2 = vld [vmem:[%s3220_s13 + $0x10] sm:$0xff]  ;;  %s2873_s16 = smov 126   ;;  %s2874_s30 = smov 127   ;;  %vm527_vm0 = vcmask 1031168  }
  0xf5   : > { %2837 = vsyncadd (%p4305_p1), [#allocation13], 4294967040  ;;  %515 = vrot.lane.b32.xlu1 %v3246_v0, %s2873_s16  ;;  %v3258_v3 = vcombine.high %v3246_v0, %v3246_v0  ;;  %460 = vst [vmem:[#allocation2 + $0x10] sm:$0xf] %v3246_v0  ;;  %v3263_v4 = vcombine.high %v3249_v1, %v3249_v1  ;;  %v3269_v5 = vcombine.high %v3252_v2, %v3252_v2  ;;  %v3276_v6 = vrot.slane %v3246_v0, 4  ;;  %s2875_s10 = smov 118  }
  0xf6   : > { %458 = vst [vmem:[#allocation2] sm:$0xf] %v3249_v1  ;;  %462 = vst [vmem:[#allocation2 + $0x20] sm:$0xf] %v3252_v2  ;;  %v3288_v7 = vrot.slane %v3249_v1, 4  ;;  %v3299_v8 = vrot.slane %v3252_v2, 4 }
  0xf7   : > { %461 = vst [vmem:[#allocation2 + $0x18] sm:$0xf] %v3258_v3  ;;  %475 = vrot.lane.b32.xlu0 %v3263_v4, %s2874_s30  ;;  %459 = vst [vmem:[#allocation2 + $0x8] sm:$0xf] %v3263_v4  ;;  %s2876_s22 = smov 117   ;;  %s2877_s14 = smov 116  }
  0xf8   : > { %463 = vst [vmem:[#allocation2 + $0x28] sm:$0xf] %v3269_v5  ;;  %s2878_s12 = smov 108   ;;  %s2879_s3 = smov 107   ;;  %v3400_v11 = vld [vmem:[%s3220_s13 + $0x18] sm:$0xf] }
  0xf9   : > { %513 = vrot.lane.b32.xlu1 %v3263_v4, %s2873_s16  ;;  %s2880_s23 = smov 106   ;;  %s2881_s11 = smov 28   ;;  %vm489_vm1 = vcmask 1039360   ;;  %464 = vst [vmem:[#allocation2 + $0x30] sm:$0xf] %v3400_v11  ;;  %vm565_vm2 = vcmask 965632  }
  0xfa   : > { %s2882_s21 = smov 27   ;;  %s2883_s17 = smov 26   ;;  %vm603_vm3 = vcmask 957440   ;;  %vm641_vm4 = vcmask 949248   ;;  %vm679_vm5 = vcmask 883712   ;;  %vm717_vm6 = vcmask 875520  }
  0xfb   : > { %477 = vrot.lane.b32.xlu0 %v3276_v6, %s2874_s30  ;;  %s2884_s4 = smov 18   ;;  %s4244_s2 = smov 17   ;;  %vm755_vm7 = vcmask 867328   ;;  %vm793_vm8 = vcmask 228352   ;;  %vm831_vm9 = vcmask 220160   ;;  %vm4276_vm10 = vcmask 211968  }
  0xfc   : > { %s4248_s0 = smov 16   ;;  %s4246_s8 = smov 8   ;;  %vm4275_vm11 = vcmask 146432   ;;  %vm4266_vm12 = vcmask 138240   ;;  %vm4264_vm13 = vcmask 130048   ;;  %vm4265_vm14 = vcmask 64512  }
  0xfd   : > { %553 = vrot.lane.b32.xlu1 %v3276_v6, %s2875_s10  ;;  %s4250_s13 = smov 7   ;;  %vm4270_vm15 = vcmask 56320   ;;  %p4357_p10 = scmp.ne.s32.totalorder %s4292_s18, 0 }
  0xff   : > { %551 = vrot.lane.b32.xlu0 %v3263_v4, %s2875_s10 }
 0x101   : > { %511 = vrot.lane.b32.xlu1 %v3249_v1, %s2873_s16 }
 0x103   : > { %473 = vrot.lane.b32.xlu0 %v3288_v7, %s2874_s30 }
 0x105   : > { %479 = vrot.lane.b32.xlu1 %v3258_v3, %s2874_s30 }
 0x107   : > { %549 = vrot.lane.b32.xlu0 %v3288_v7, %s2875_s10 }
 0x109   : > { %517 = vrot.lane.b32.xlu1 %v3258_v3, %s2873_s16 }
 0x10b   : > { %481 = vrot.lane.b32.xlu0 %v3299_v8, %s2874_s30 }
 0x10d   : > { %555 = vrot.lane.b32.xlu1 %v3258_v3, %s2875_s10 }
 0x10f   : > { %519 = vrot.lane.b32.xlu0 %v3252_v2, %s2873_s16 }
 0x111   : > { %589 = vrot.lane.b32.xlu1 %v3263_v4, %s2876_s22 }
 0x113   : > { %557 = vrot.lane.b32.xlu0 %v3299_v8, %s2875_s10 }
 0x115   : > { %627 = vrot.lane.b32.xlu1 %v3263_v4, %s2877_s14 }
 0x117   : > { %591 = vrot.lane.b32.xlu0 %v3246_v0, %s2876_s22 }
 0x119   : > { %665 = vrot.lane.b32.xlu1 %v3263_v4, %s2878_s12 }
 0x11b   : > { %629 = vrot.lane.b32.xlu0 %v3276_v6, %s2877_s14 }
 0x11d   : > { %703 = vrot.lane.b32.xlu1 %v3263_v4, %s2879_s3 }
 0x11f   : > { %667 = vrot.lane.b32.xlu0 %v3246_v0, %s2878_s12 }
 0x121   : > { %587 = vrot.lane.b32.xlu1 %v3249_v1, %s2876_s22 }
 0x123   : > { %705 = vrot.lane.b32.xlu0 %v3276_v6, %s2879_s3 }
 0x125   : > { %663 = vrot.lane.b32.xlu1 %v3249_v1, %s2878_s12 }
 0x127   : > { %625 = vrot.lane.b32.xlu0 %v3288_v7, %s2877_s14 }
 0x129   : > { %593 = vrot.lane.b32.xlu1 %v3258_v3, %s2876_s22 }
 0x12b   : > { %701 = vrot.lane.b32.xlu0 %v3288_v7, %s2879_s3 }
 0x12d   : > { %631 = vrot.lane.b32.xlu1 %v3258_v3, %s2877_s14 }
 0x12f   : > { %595 = vrot.lane.b32.xlu0 %v3252_v2, %s2876_s22 }
 0x131   : > { %669 = vrot.lane.b32.xlu1 %v3258_v3, %s2878_s12 }
 0x133   : > { %633 = vrot.lane.b32.xlu0 %v3299_v8, %s2877_s14 }
 0x135   : > { %707 = vrot.lane.b32.xlu1 %v3258_v3, %s2879_s3 }
 0x137   : > { %671 = vrot.lane.b32.xlu0 %v3252_v2, %s2878_s12 }
 0x139   : > { %741 = vrot.lane.b32.xlu1 %v3263_v4, %s2880_s23 }
 0x13b   : > { %709 = vrot.lane.b32.xlu0 %v3299_v8, %s2879_s3 }
 0x13d   : > { %779 = vrot.lane.b32.xlu1 %v3263_v4, %s2881_s11 }
 0x13f   : > { %743 = vrot.lane.b32.xlu0 %v3246_v0, %s2880_s23 }
 0x141   : > { %817 = vrot.lane.b32.xlu1 %v3263_v4, %s2882_s21 }
 0x143   : > { %781 = vrot.lane.b32.xlu0 %v3276_v6, %s2881_s11 }
 0x145   : > { %855 = vrot.lane.b32.xlu1 %v3263_v4, %s2883_s17 }
 0x147   : > { %819 = vrot.lane.b32.xlu0 %v3246_v0, %s2882_s21 }
 0x149   : > { %739 = vrot.lane.b32.xlu1 %v3249_v1, %s2880_s23 }
 0x14b   : > { %857 = vrot.lane.b32.xlu0 %v3276_v6, %s2883_s17 }
 0x14d   : > { %815 = vrot.lane.b32.xlu1 %v3249_v1, %s2882_s21 }
 0x14f   : > { %777 = vrot.lane.b32.xlu0 %v3288_v7, %s2881_s11 }
 0x151   : > { %745 = vrot.lane.b32.xlu1 %v3258_v3, %s2880_s23 }
 0x153   : > { %853 = vrot.lane.b32.xlu0 %v3288_v7, %s2883_s17 }
 0x155   : > { %783 = vrot.lane.b32.xlu1 %v3258_v3, %s2881_s11 }
 0x157   : > { %747 = vrot.lane.b32.xlu0 %v3252_v2, %s2880_s23 }
 0x159   : > { %821 = vrot.lane.b32.xlu1 %v3258_v3, %s2882_s21 }
 0x15b   : > { %785 = vrot.lane.b32.xlu0 %v3299_v8, %s2881_s11 }
 0x15d   : > { %859 = vrot.lane.b32.xlu1 %v3258_v3, %s2883_s17 }
 0x15f   : > { %823 = vrot.lane.b32.xlu0 %v3252_v2, %s2882_s21 }
 0x161   : > { %893 = vrot.lane.b32.xlu1 %v3263_v4, %s2884_s4 }
 0x163   : > { %861 = vrot.lane.b32.xlu0 %v3299_v8, %s2883_s17 }
 0x165   : > { %931 = vrot.lane.b32.xlu1 %v3263_v4, %s4244_s2 }
 0x167   : > { %v516_v9 = vpop.permute.xlu1 %515  ;;  %895 = vrot.lane.b32.xlu0 %v3246_v0, %s2884_s4 }
 0x169   : > { %969 = vrot.lane.b32.xlu1 %v3263_v4, %s4248_s0  ;;  %v476_v10 = vpop.permute.xlu0 %475 }
 0x16b   : > { %v514_v12 = vpop.permute.xlu1 %513  ;;  %933 = vrot.lane.b32.xlu0 %v3276_v6, %s4244_s2 }
 0x16c   : > { %v529_v13 = vsel %vm527_vm0, %v514_v12, %v516_v9 }
 0x16d   : > { %543 = vst [vmem:[#allocation2 + $0x40] sm:$0xf] %v529_v13  ;;  %1007 = vrot.lane.b32.xlu1 %v3263_v4, %s4246_s8  ;;  %v478_v14 = vpop.permute.xlu0 %477 }
 0x16e   : > { %v491_v15 = vsel %vm489_vm1, %v476_v10, %v478_v14 }
 0x16f   : > { %505 = vst [vmem:[#allocation2 + $0x8] sm:$0xf0] %v491_v15  ;;  %v554_v16 = vpop.permute.xlu1 %553  ;;  %971 = vrot.lane.b32.xlu0 %v3246_v0, %s4248_s0 }
 0x171   : > { %891 = vrot.lane.b32.xlu1 %v3249_v1, %s2884_s4  ;;  %v552_v17 = vpop.permute.xlu0 %551 }
 0x172   : > { %v567_v18 = vsel %vm565_vm2, %v552_v17, %v554_v16 }
 0x173   : > { %581 = vst [vmem:[#allocation2 + $0x40] sm:$0xf0] %v567_v18  ;;  %v512_v19 = vpop.permute.xlu1 %511  ;;  %1009 = vrot.lane.b32.xlu0 %v3276_v6, %s4246_s8 }
 0x174   : > { %v528_v20 = vsel %vm527_vm0, %v512_v19, %v514_v12 }
 0x175   : > { %542 = vst [vmem:[#allocation2 + $0x38] sm:$0xf] %v528_v20  ;;  %967 = vrot.lane.b32.xlu1 %v3249_v1, %s4248_s0  ;;  %v474_v21 = vpop.permute.xlu0 %473 }
 0x176   : > { %v490_v22 = vsel %vm489_vm1, %v474_v21, %v476_v10  ;;  %v1464_v27 = vld [vmem:[#allocation2 + $0x8] sm:$0xff] }
 0x177   : > { %504 = vst [vmem:[#allocation2] sm:$0xf0] %v490_v22  ;;  %v480_v23 = vpop.permute.xlu1 %479  ;;  %929 = vrot.lane.b32.xlu0 %v3288_v7, %s4244_s2 }
 0x178   : > { %v492_v24 = vsel %vm489_vm1, %v478_v14, %v480_v23 }
 0x179   : > { %506 = vst [vmem:[#allocation2 + $0x10] sm:$0xf0] %v492_v24  ;;  %897 = vrot.lane.b32.xlu1 %v3258_v3, %s2884_s4  ;;  %v550_v25 = vpop.permute.xlu0 %549 }
 0x17a   : > { %v566_v26 = vsel %vm565_vm2, %v550_v25, %v552_v17  ;;  %v1471_v28 = vld [vmem:[#allocation2 + $0x40] sm:$0xff] }
 0x17b   : > { %580 = vst [vmem:[#allocation2 + $0x38] sm:$0xf0] %v566_v26  ;;  %v518_v29 = vpop.permute.xlu1 %517  ;;  %1005 = vrot.lane.b32.xlu0 %v3288_v7, %s4246_s8  ;;  %v2290_v30 = vpack.c.bf16 %v1471_v28, %v1464_v27 }
 0x17c   : > { %v530_v31 = vsel %vm527_vm0, %v516_v9, %v518_v29 }
 0x17d   : > { %544 = vst [vmem:[#allocation2 + $0x48] sm:$0xf] %v530_v31  ;;  %935 = vrot.lane.b32.xlu1 %v3258_v3, %s4244_s2  ;;  %v3431_v32 = vpop.permute.xlu0 %481  ;;  %2291 = vmatprep.subr.bf16.mxu0 %v2290_v30 }
 0x17e   : > { %v493_v33 = vsel %vm489_vm1, %v480_v23, %v3431_v32  ;;  %v1463_v38 = vld [vmem:[#allocation2] sm:$0xff] }
 0x17f   : > { %507 = vst [vmem:[#allocation2 + $0x18] sm:$0xf0] %v493_v33  ;;  %v556_v34 = vpop.permute.xlu1 %555  ;;  %899 = vrot.lane.b32.xlu0 %v3252_v2, %s2884_s4 }
 0x180   : > { %v568_v35 = vsel %vm565_vm2, %v554_v16, %v556_v34  ;;  %v1465_v55 = vld [vmem:[#allocation2 + $0x10] sm:$0xff] }
 0x181   : > { %582 = vst [vmem:[#allocation2 + $0x48] sm:$0xf0] %v568_v35  ;;  %973 = vrot.lane.b32.xlu1 %v3258_v3, %s4248_s0  ;;  %v3440_v36 = vpop.permute.xlu0 %519 }
 0x182   : > { %v531_v37 = vsel %vm527_vm0, %v518_v29, %v3440_v36  ;;  %v1470_v39 = vld [vmem:[#allocation2 + $0x38] sm:$0xff] }
 0x183   : > { %545 = vst [vmem:[#allocation2 + $0x50] sm:$0xf] %v531_v37  ;;  %v590_v40 = vpop.permute.xlu1 %589  ;;  %937 = vrot.lane.b32.xlu0 %v3299_v8, %s4244_s2  ;;  %v2292_v41 = vpack.c.bf16 %v1470_v39, %v1463_v38  ;;  %s4252_s2 = smov 6  }
 0x185   : > { %1011 = vrot.lane.b32.xlu1 %v3258_v3, %s4246_s8  ;;  %v3448_v42 = vpop.permute.xlu0 %557  ;;  %2293 = vmatpush1.bf16.msra.mxu0 %v2292_v41 }
 0x186   : > { %v569_v43 = vsel %vm565_vm2, %v556_v34, %v3448_v42  ;;  %v1466_v51 = vld [vmem:[#allocation2 + $0x18] sm:$0xff] }
 0x187   : > { %583 = vst [vmem:[#allocation2 + $0x50] sm:$0xf0] %v569_v43  ;;  %v628_v44 = vpop.permute.xlu1 %627  ;;  %975 = vrot.lane.b32.xlu0 %v3252_v2, %s4248_s0  ;;  %s4254_s0 = smov 55  }
 0x188   : > { %v1472_v49 = vld [vmem:[#allocation2 + $0x48] sm:$0xff] }
 0x189   : > { %1045 = vrot.lane.b32.xlu1 %v3263_v4, %s4250_s13  ;;  %v592_v45 = vpop.permute.xlu0 %591  ;;  %v2322_v56 = vpack.c.bf16 %v1472_v49, %v1465_v55 }
 0x18a   : > { %v605_v46 = vsel %vm603_vm3, %v590_v40, %v592_v45 }
 0x18b   : > { %619 = vst [vmem:[#allocation2 + $0x78] sm:$0xf] %v605_v46  ;;  %v666_v47 = vpop.permute.xlu1 %665  ;;  %1013 = vrot.lane.b32.xlu0 %v3299_v8, %s4246_s8  ;;  %s4256_s8 = smov 56  }
 0x18d   : > { %1083 = vrot.lane.b32.xlu1 %v3263_v4, %s4252_s2  ;;  %v630_v48 = vpop.permute.xlu0 %629 }
 0x18e   : > { %v643_v50 = vsel %vm641_vm4, %v628_v44, %v630_v48  ;;  %v1473_v52 = vld [vmem:[#allocation2 + $0x50] sm:$0xff] }
 0x18f   : > { %657 = vst [vmem:[#allocation2 + $0x78] sm:$0xf0] %v643_v50  ;;  %v704_v53 = vpop.permute.xlu1 %703  ;;  %1047 = vrot.lane.b32.xlu0 %v3246_v0, %s4250_s13  ;;  %v2320_v54 = vpack.c.bf16 %v1473_v52, %v1466_v51 }
 0x191   : > { %1121 = vrot.lane.b32.xlu1 %v3246_v0, %s4256_s8  ;;  %2321 = vmatprep.subr.bf16.mxu1 %v2320_v54  ;;  %v668_v57 = vpop.permute.xlu0 %667 }
 0x192   : > { %v681_v58 = vsel %vm679_vm5, %v666_v47, %v668_v57  ;;  %2323 = vmatpush1.bf16.msra.mxu1 %v2322_v56 }
 0x193   : > { %695 = vst [vmem:[#allocation2 + $0xb0] sm:$0xf] %v681_v58  ;;  %v588_v59 = vpop.permute.xlu1 %587  ;;  %1085 = vrot.lane.b32.xlu0 %v3276_v6, %s4252_s2 }
 0x194   : > { %v604_v60 = vsel %vm603_vm3, %v588_v59, %v590_v40 }
 0x195   : > { %618 = vst [vmem:[#allocation2 + $0x70] sm:$0xf] %v604_v60  ;;  %1160 = vrot.lane.b32.xlu1 %v3276_v6, %s4254_s0  ;;  %v706_v61 = vpop.permute.xlu0 %705 }
 0x196   : > { %v719_v62 = vsel %vm717_vm6, %v704_v53, %v706_v61  ;;  %v1478_v17 = vld [vmem:[#allocation2 + $0x78] sm:$0xff] }
 0x197   : > { %733 = vst [vmem:[#allocation2 + $0xb0] sm:$0xf0] %v719_v62  ;;  %v664_v63 = vpop.permute.xlu1 %663  ;;  %1123 = vrot.lane.b32.xlu0 %v3258_v3, %s4256_s8 }
 0x198   : > { %v680_v9 = vsel %vm679_vm5, %v664_v63, %v666_v47 }
 0x199   : > { %694 = vst [vmem:[#allocation2 + $0xa8] sm:$0xf] %v680_v9  ;;  %1043 = vrot.lane.b32.xlu1 %v3249_v1, %s4250_s13  ;;  %v626_v10 = vpop.permute.xlu0 %625 }
 0x19a   : > { %v642_v12 = vsel %vm641_vm4, %v626_v10, %v628_v44 }
 0x19b   : > { %656 = vst [vmem:[#allocation2 + $0x70] sm:$0xf0] %v642_v12  ;;  %v594_v13 = vpop.permute.xlu1 %593  ;;  %1162 = vrot.lane.b32.xlu0 %v3258_v3, %s4254_s0 }
 0x19c   : > { %v606_v14 = vsel %vm603_vm3, %v592_v45, %v594_v13 }
 0x19d   : > { %620 = vst [vmem:[#allocation2 + $0x80] sm:$0xf] %v606_v14  ;;  %1119 = vrot.lane.b32.xlu1 %v3263_v4, %s4256_s8  ;;  %v702_v15 = vpop.permute.xlu0 %701 }
 0x19e   : > { %v718_v16 = vsel %vm717_vm6, %v702_v15, %v704_v53  ;;  %v1485_v18 = vld [vmem:[#allocation2 + $0xb0] sm:$0xff] }
 0x19f   : > { %732 = vst [vmem:[#allocation2 + $0xa8] sm:$0xf0] %v718_v16  ;;  %v632_v1 = vpop.permute.xlu1 %631  ;;  %1081 = vrot.lane.b32.xlu0 %v3288_v7, %s4252_s2  ;;  %v2294_v19 = vpack.c.bf16 %v1485_v18, %v1478_v17 }
 0x1a0   : > { %v644_v20 = vsel %vm641_vm4, %v630_v48, %v632_v1 }
 0x1a1   : > { %658 = vst [vmem:[#allocation2 + $0x80] sm:$0xf0] %v644_v20  ;;  %1049 = vrot.lane.b32.xlu1 %v3258_v3, %s4250_s13  ;;  %v3490_v21 = vpop.permute.xlu0 %595  ;;  %2295 = vmatprep.subr.bf16.mxu0 %v2294_v19 }
 0x1a2   : > { %v607_v22 = vsel %vm603_vm3, %v594_v13, %v3490_v21  ;;  %v1477_v26 = vld [vmem:[#allocation2 + $0x70] sm:$0xff] }
 0x1a3   : > { %621 = vst [vmem:[#allocation2 + $0x88] sm:$0xf] %v607_v22  ;;  %v670_v23 = vpop.permute.xlu1 %669  ;;  %1158 = vrot.lane.b32.xlu0 %v3263_v4, %s4254_s0 }
 0x1a4   : > { %v682_v7 = vsel %vm679_vm5, %v668_v57, %v670_v23 }
 0x1a5   : > { %696 = vst [vmem:[#allocation2 + $0xb8] sm:$0xf] %v682_v7  ;;  %1087 = vrot.lane.b32.xlu1 %v3258_v3, %s4252_s2  ;;  %v3499_v24 = vpop.permute.xlu0 %633 }
 0x1a6   : > { %v645_v25 = vsel %vm641_vm4, %v632_v1, %v3499_v24  ;;  %v1484_v27 = vld [vmem:[#allocation2 + $0xa8] sm:$0xff] }
 0x1a7   : > { %659 = vst [vmem:[#allocation2 + $0x88] sm:$0xf0] %v645_v25  ;;  %v708_v28 = vpop.permute.xlu1 %707  ;;  %1051 = vrot.lane.b32.xlu0 %v3252_v2, %s4250_s13  ;;  %v2296_v29 = vpack.c.bf16 %v1484_v27, %v1477_v26  ;;  %s4258_s13 = smov 54  }
 0x1a8   : > { %v720_v30 = vsel %vm717_vm6, %v706_v61, %v708_v28  ;;  %v1479_v50 = vld [vmem:[#allocation2 + $0x80] sm:$0xff] }
 0x1a9   : > { %734 = vst [vmem:[#allocation2 + $0xb8] sm:$0xf0] %v720_v30  ;;  %1125 = vrot.lane.b32.xlu1 %v3252_v2, %s4256_s8  ;;  %v3508_v31 = vpop.permute.xlu0 %671  ;;  %2297 = vmatpush1.bf16.msra.mxu0 %v2296_v29 }
 0x1aa   : > { %v683_v33 = vsel %vm679_vm5, %v670_v23, %v3508_v31 }
 0x1ab   : > { %697 = vst [vmem:[#allocation2 + $0xc0] sm:$0xf] %v683_v33  ;;  %v742_v34 = vpop.permute.xlu1 %741  ;;  %1089 = vrot.lane.b32.xlu0 %v3299_v8, %s4252_s2  ;;  %s4260_s2 = smov 46  }
 0x1ad   : > { %1164 = vrot.lane.b32.xlu1 %v3299_v8, %s4254_s0  ;;  %v3516_v35 = vpop.permute.xlu0 %709 }
 0x1ae   : > { %v721_v37 = vsel %vm717_vm6, %v708_v28, %v3516_v35  ;;  %v1480_v46 = vld [vmem:[#allocation2 + $0x88] sm:$0xff] }
 0x1af   : > { %735 = vst [vmem:[#allocation2 + $0xc0] sm:$0xf0] %v721_v37  ;;  %v780_v38 = vpop.permute.xlu1 %779  ;;  %1127 = vrot.lane.b32.xlu0 %v3269_v5, %s4256_s8  ;;  %s4262_s8 = smov 44  }
 0x1b0   : > { %v1486_v44 = vld [vmem:[#allocation2 + $0xb8] sm:$0xff] }
 0x1b1   : > { %1198 = vrot.lane.b32.xlu1 %v3246_v0, %s4258_s13  ;;  %v744_v39 = vpop.permute.xlu0 %743  ;;  %v2326_v51 = vpack.c.bf16 %v1486_v44, %v1479_v50 }
 0x1b2   : > { %v757_v40 = vsel %vm755_vm7, %v742_v34, %v744_v39 }
 0x1b3   : > { %771 = vst [vmem:[#allocation2 + $0xe8] sm:$0xf] %v757_v40  ;;  %v818_v41 = vpop.permute.xlu1 %817  ;;  %1166 = vrot.lane.b32.xlu0 %v3269_v5, %s4254_s0  ;;  %s2894_s0 = smov 45  }
 0x1b5   : > { %1236 = vrot.lane.b32.xlu1 %v3276_v6, %s4260_s2  ;;  %v782_v43 = vpop.permute.xlu0 %781 }
 0x1b6   : > { %v795_v45 = vsel %vm793_vm8, %v780_v38, %v782_v43  ;;  %v1487_v47 = vld [vmem:[#allocation2 + $0xc0] sm:$0xff] }
 0x1b7   : > { %809 = vst [vmem:[#allocation2 + $0xe8] sm:$0xf0] %v795_v45  ;;  %v856_v48 = vpop.permute.xlu1 %855  ;;  %1200 = vrot.lane.b32.xlu0 %v3258_v3, %s4258_s13  ;;  %v2324_v49 = vpack.c.bf16 %v1487_v47, %v1480_v46 }
 0x1b9   : > { %1274 = vrot.lane.b32.xlu1 %v3246_v0, %s2894_s0  ;;  %2325 = vmatprep.subr.bf16.mxu1 %v2324_v49  ;;  %v820_v52 = vpop.permute.xlu0 %819 }
 0x1ba   : > { %v833_v53 = vsel %vm831_vm9, %v818_v41, %v820_v52  ;;  %2327 = vmatpush1.bf16.msra.mxu1 %v2326_v51 }
 0x1bb   : > { %847 = vst [vmem:[#allocation2 + $0x120] sm:$0xf] %v833_v53  ;;  %v740_v54 = vpop.permute.xlu1 %739  ;;  %1238 = vrot.lane.b32.xlu0 %v3258_v3, %s4260_s2 }
 0x1bc   : > { %v756_v55 = vsel %vm755_vm7, %v740_v54, %v742_v34 }
 0x1bd   : > { %770 = vst [vmem:[#allocation2 + $0xe0] sm:$0xf] %v756_v55  ;;  %1312 = vrot.lane.b32.xlu1 %v3276_v6, %s4262_s8  ;;  %v858_v56 = vpop.permute.xlu0 %857 }
 0x1be   : > { %v871_v57 = vsel %vm4276_vm10, %v856_v48, %v858_v56  ;;  %v1492_v12 = vld [vmem:[#allocation2 + $0xe8] sm:$0xff] }
 0x1bf   : > { %885 = vst [vmem:[#allocation2 + $0x120] sm:$0xf0] %v871_v57  ;;  %v816_v58 = vpop.permute.xlu1 %815  ;;  %1276 = vrot.lane.b32.xlu0 %v3258_v3, %s2894_s0 }
 0x1c0   : > { %v832_v59 = vsel %vm831_vm9, %v816_v58, %v818_v41  ;;  %v3615_v58 = vrot.slane %v3400_v11, 4 }
 0x1c1   : > { %846 = vst [vmem:[#allocation2 + $0x118] sm:$0xf] %v832_v59  ;;  %1196 = vrot.lane.b32.xlu1 %v3263_v4, %s4258_s13  ;;  %v778_v60 = vpop.permute.xlu0 %777 }
 0x1c2   : > { %v794_v61 = vsel %vm793_vm8, %v778_v60, %v780_v38 }
 0x1c3   : > { %808 = vst [vmem:[#allocation2 + $0xe0] sm:$0xf0] %v794_v61  ;;  %v746_v62 = vpop.permute.xlu1 %745  ;;  %1314 = vrot.lane.b32.xlu0 %v3258_v3, %s4262_s8 }
 0x1c4   : > { %v758_v63 = vsel %vm755_vm7, %v744_v39, %v746_v62 }
 0x1c5   : > { %772 = vst [vmem:[#allocation2 + $0xf0] sm:$0xf] %v758_v63  ;;  %1272 = vrot.lane.b32.xlu1 %v3263_v4, %s2894_s0  ;;  %v854_v9 = vpop.permute.xlu0 %853 }
 0x1c6   : > { %v870_v10 = vsel %vm4276_vm10, %v854_v9, %v856_v48  ;;  %v1499_v13 = vld [vmem:[#allocation2 + $0x120] sm:$0xff] }
 0x1c7   : > { %884 = vst [vmem:[#allocation2 + $0x118] sm:$0xf0] %v870_v10  ;;  %v784_v14 = vpop.permute.xlu1 %783  ;;  %1234 = vrot.lane.b32.xlu0 %v3263_v4, %s4260_s2  ;;  %v2298_v15 = vpack.c.bf16 %v1499_v13, %v1492_v12 }
 0x1c8   : > { %v796_v16 = vsel %vm793_vm8, %v782_v43, %v784_v14 }
 0x1c9   : > { %810 = vst [vmem:[#allocation2 + $0xf0] sm:$0xf0] %v796_v16  ;;  %1202 = vrot.lane.b32.xlu1 %v3252_v2, %s4258_s13  ;;  %v3558_v17 = vpop.permute.xlu0 %747  ;;  %2299 = vmatprep.subr.bf16.mxu0 %v2298_v15 }
 0x1ca   : > { %v759_v18 = vsel %vm755_vm7, %v746_v62, %v3558_v17  ;;  %v1491_v23 = vld [vmem:[#allocation2 + $0xe0] sm:$0xff] }
 0x1cb   : > { %773 = vst [vmem:[#allocation2 + $0xf8] sm:$0xf] %v759_v18  ;;  %v822_v1 = vpop.permute.xlu1 %821  ;;  %1310 = vrot.lane.b32.xlu0 %v3263_v4, %s4262_s8  ;;  %v2899_v18 = vmov 0.0  }
 0x1cc   : > { %v834_v19 = vsel %vm831_vm9, %v820_v52, %v822_v1  ;;  %1656 = vmatprep.mubr.f32.mxu0 %v2899_v18  ;;  %1727 = vmatprep.mubr.f32.mxu1 %v2899_v18 }
 0x1cd   : > { %848 = vst [vmem:[#allocation2 + $0x128] sm:$0xf] %v834_v19  ;;  %1240 = vrot.lane.b32.xlu1 %v3299_v8, %s4260_s2  ;;  %v3567_v20 = vpop.permute.xlu0 %785 }
 0x1ce   : > { %v797_v22 = vsel %vm793_vm8, %v784_v14, %v3567_v20  ;;  %v1498_v7 = vld [vmem:[#allocation2 + $0x118] sm:$0xff] }
 0x1cf   : > { %811 = vst [vmem:[#allocation2 + $0xf8] sm:$0xf0] %v797_v22  ;;  %v860_v25 = vpop.permute.xlu1 %859  ;;  %1204 = vrot.lane.b32.xlu0 %v3269_v5, %s4258_s13  ;;  %v2300_v26 = vpack.c.bf16 %v1498_v7, %v1491_v23  ;;  %s2896_s13 = smov 36  }
 0x1d0   : > { %v872_v27 = vsel %vm4276_vm10, %v858_v56, %v860_v25  ;;  %v1493_v49 = vld [vmem:[#allocation2 + $0xf0] sm:$0xff] }
 0x1d1   : > { %886 = vst [vmem:[#allocation2 + $0x128] sm:$0xf0] %v872_v27  ;;  %1278 = vrot.lane.b32.xlu1 %v3252_v2, %s2894_s0  ;;  %v3576_v28 = vpop.permute.xlu0 %823  ;;  %2301 = vmatpush1.bf16.msra.mxu0 %v2300_v26 }
 0x1d2   : > { %v835_v29 = vsel %vm831_vm9, %v822_v1, %v3576_v28 }
 0x1d3   : > { %849 = vst [vmem:[#allocation2 + $0x130] sm:$0xf] %v835_v29  ;;  %v894_v30 = vpop.permute.xlu1 %893  ;;  %1242 = vrot.lane.b32.xlu0 %v3269_v5, %s4260_s2  ;;  %s2897_s2 = smov 35  }
 0x1d5   : > { %1316 = vrot.lane.b32.xlu1 %v3299_v8, %s4262_s8  ;;  %v3584_v33 = vpop.permute.xlu0 %861 }
 0x1d6   : > { %v873_v34 = vsel %vm4276_vm10, %v860_v25, %v3584_v33  ;;  %v1494_v45 = vld [vmem:[#allocation2 + $0xf8] sm:$0xff] }
 0x1d7   : > { %887 = vst [vmem:[#allocation2 + $0x130] sm:$0xf0] %v873_v34  ;;  %v932_v37 = vpop.permute.xlu1 %931  ;;  %1280 = vrot.lane.b32.xlu0 %v3269_v5, %s2894_s0 }
 0x1d8   : > { %v1500_v43 = vld [vmem:[#allocation2 + $0x128] sm:$0xff] }
 0x1d9   : > { %1350 = vrot.lane.b32.xlu1 %v3246_v0, %s2896_s13  ;;  %v896_v38 = vpop.permute.xlu0 %895  ;;  %v2330_v50 = vpack.c.bf16 %v1500_v43, %v1493_v49 }
 0x1da   : > { %v909_v39 = vsel %vm4275_vm11, %v894_v30, %v896_v38 }
 0x1db   : > { %923 = vst [vmem:[#allocation2 + $0x158] sm:$0xf] %v909_v39  ;;  %v970_v40 = vpop.permute.xlu1 %969  ;;  %1318 = vrot.lane.b32.xlu0 %v3269_v5, %s4262_s8  ;;  %s2898_s8 = smov 34  }
 0x1dd   : > { %1388 = vrot.lane.b32.xlu1 %v3276_v6, %s2897_s2  ;;  %v934_v41 = vpop.permute.xlu0 %933 }
 0x1de   : > { %v947_v44 = vsel %vm4266_vm12, %v932_v37, %v934_v41  ;;  %v1501_v46 = vld [vmem:[#allocation2 + $0x130] sm:$0xff] }
 0x1df   : > { %961 = vst [vmem:[#allocation2 + $0x158] sm:$0xf0] %v947_v44  ;;  %v1008_v47 = vpop.permute.xlu1 %1007  ;;  %1352 = vrot.lane.b32.xlu0 %v3258_v3, %s2896_s13  ;;  %v2328_v48 = vpack.c.bf16 %v1501_v46, %v1494_v45 }
 0x1e1   : > { %1426 = vrot.lane.b32.xlu1 %v3246_v0, %s2898_s8  ;;  %2329 = vmatprep.subr.bf16.mxu1 %v2328_v48  ;;  %v972_v6 = vpop.permute.xlu0 %971 }
 0x1e2   : > { %v985_v51 = vsel %vm4264_vm13, %v970_v40, %v972_v6  ;;  %2331 = vmatpush1.bf16.msra.mxu1 %v2330_v50 }
 0x1e3   : > { %999 = vst [vmem:[#allocation2 + $0x190] sm:$0xf] %v985_v51  ;;  %v892_v52 = vpop.permute.xlu1 %891  ;;  %1390 = vrot.lane.b32.xlu0 %v3258_v3, %s2897_s2 }
 0x1e4   : > { %v908_v53 = vsel %vm4275_vm11, %v892_v52, %v894_v30 }
 0x1e5   : > { %922 = vst [vmem:[#allocation2 + $0x150] sm:$0xf] %v908_v53  ;;  %1348 = vrot.lane.b32.xlu1 %v3263_v4, %s2896_s13  ;;  %v1010_v54 = vpop.permute.xlu0 %1009 }
 0x1e6   : > { %v1023_v0 = vsel %vm4265_vm14, %v1008_v47, %v1010_v54  ;;  %v1506_v63 = vld [vmem:[#allocation2 + $0x158] sm:$0xff] }
 0x1e7   : > { %1037 = vst [vmem:[#allocation2 + $0x190] sm:$0xf0] %v1023_v0  ;;  %v968_v55 = vpop.permute.xlu1 %967  ;;  %1428 = vrot.lane.b32.xlu0 %v3258_v3, %s2898_s8 }
 0x1e8   : > { %v984_v56 = vsel %vm4264_vm13, %v968_v55, %v970_v40 }
 0x1e9   : > { %998 = vst [vmem:[#allocation2 + $0x188] sm:$0xf] %v984_v56  ;;  %1424 = vrot.lane.b32.xlu1 %v3263_v4, %s2898_s8  ;;  %v930_v57 = vpop.permute.xlu0 %929  ;;  %v3686_v56 = vld [vmem:[%s3227_s15] sm:$0xff]  ;;  %s4306_s15 = smov 17  }
 0x1ea   : > { %v946_v59 = vsel %vm4266_vm12, %v930_v57, %v932_v37 }
 0x1eb   : > { %960 = vst [vmem:[#allocation2 + $0x150] sm:$0xf0] %v946_v59  ;;  %v898_v60 = vpop.permute.xlu1 %897  ;;  %1386 = vrot.lane.b32.xlu0 %v3263_v4, %s2897_s2 }
 0x1ec   : > { %v910_v61 = vsel %vm4275_vm11, %v896_v38, %v898_v60 }
 0x1ed   : > { %924 = vst [vmem:[#allocation2 + $0x160] sm:$0xf] %v910_v61  ;;  %485 = vrot.lane.b32.xlu1 %v3615_v58, %s2874_s30  ;;  %v1006_v3 = vpop.permute.xlu0 %1005  ;;  %v3694_v61 = vrot.slane %v3686_v56, 4 }
 0x1ee   : > { %v1022_v62 = vsel %vm4265_vm14, %v1006_v3, %v1008_v47  ;;  %v1513_v9 = vld [vmem:[#allocation2 + $0x190] sm:$0xff] }
 0x1ef   : > { %1036 = vst [vmem:[#allocation2 + $0x188] sm:$0xf0] %v1022_v62  ;;  %v936_v10 = vpop.permute.xlu1 %935  ;;  %483 = vrot.lane.b32.xlu0 %v3269_v5, %s2874_s30  ;;  %v2302_v12 = vpack.c.bf16 %v1513_v9, %v1506_v63 }
 0x1f0   : > { %v948_v13 = vsel %vm4266_vm12, %v934_v41, %v936_v10 }
 0x1f1   : > { %962 = vst [vmem:[#allocation2 + $0x160] sm:$0xf0] %v948_v13  ;;  %523 = vrot.lane.b32.xlu1 %v3400_v11, %s2873_s16  ;;  %v3629_v4 = vpop.permute.xlu0 %899  ;;  %2303 = vmatprep.subr.bf16.mxu0 %v2302_v12 }
 0x1f2   : > { %v911_v14 = vsel %vm4275_vm11, %v898_v60, %v3629_v4  ;;  %v1505_v22 = vld [vmem:[#allocation2 + $0x150] sm:$0xff]  ;;  %vm2900_vm11 = vmmov 1  }
 0x1f3   : > { %925 = vst [vmem:[#allocation2 + $0x168] sm:$0xf] %v911_v14  ;;  %v974_v15 = vpop.permute.xlu1 %973  ;;  %521 = vrot.lane.b32.xlu0 %v3269_v5, %s2873_s16 }
 0x1f4   : > { %v986_v16 = vsel %vm4264_vm13, %v972_v6, %v974_v15 }
 0x1f5   : > { %1000 = vst [vmem:[#allocation2 + $0x198] sm:$0xf] %v986_v16  ;;  %561 = vrot.lane.b32.xlu1 %v3615_v58, %s2875_s10  ;;  %v3640_v1 = vpop.permute.xlu0 %937 }
 0x1f6   : > { %v949_v19 = vsel %vm4266_vm12, %v936_v10, %v3640_v1  ;;  %v1512_v23 = vld [vmem:[#allocation2 + $0x188] sm:$0xff]  ;;  %vm4269_vm12 = vcmask 449536  }
 0x1f7   : > { %963 = vst [vmem:[#allocation2 + $0x168] sm:$0xf0] %v949_v19  ;;  %v1012_v7 = vpop.permute.xlu1 %1011  ;;  %559 = vrot.lane.b32.xlu0 %v3269_v5, %s2875_s10  ;;  %v2304_v25 = vpack.c.bf16 %v1512_v23, %v1505_v22 }
 0x1f8   : > { %v1024_v26 = vsel %vm4265_vm14, %v1010_v54, %v1012_v7  ;;  %v1507_v49 = vld [vmem:[#allocation2 + $0x160] sm:$0xff] }
 0x1f9   : > { %1038 = vst [vmem:[#allocation2 + $0x198] sm:$0xf0] %v1024_v26  ;;  %1356 = vrot.lane.b32.xlu1 %v3269_v5, %s2896_s13  ;;  %v3649_v27 = vpop.permute.xlu0 %975  ;;  %2305 = vmatpush1.bf16.msra.mxu0 %v2304_v25 }
 0x1fa   : > { %v987_v29 = vsel %vm4264_vm13, %v974_v15, %v3649_v27  ;;  %vm4267_vm13 = vcmask 48128  }
 0x1fb   : > { %1001 = vst [vmem:[#allocation2 + $0x1a0] sm:$0xf] %v987_v29  ;;  %v1046_v30 = vpop.permute.xlu1 %1045  ;;  %1354 = vrot.lane.b32.xlu0 %v3252_v2, %s2896_s13 }
 0x1fd   : > { %1394 = vrot.lane.b32.xlu1 %v3269_v5, %s2897_s2  ;;  %v3657_v34 = vpop.permute.xlu0 %1013 }
 0x1fe   : > { %v1025_v37 = vsel %vm4265_vm14, %v1012_v7, %v3657_v34  ;;  %v1508_v45 = vld [vmem:[#allocation2 + $0x168] sm:$0xff]  ;;  %vm4268_vm14 = vcmask 457728  }
 0x1ff   : > { %1039 = vst [vmem:[#allocation2 + $0x1a0] sm:$0xf0] %v1025_v37  ;;  %v1084_v38 = vpop.permute.xlu1 %1083  ;;  %1392 = vrot.lane.b32.xlu0 %v3299_v8, %s2897_s2 }
 0x200   : > { %v1514_v44 = vld [vmem:[#allocation2 + $0x198] sm:$0xff] }
 0x201   : > { %1432 = vrot.lane.b32.xlu1 %v3269_v5, %s2898_s8  ;;  %v1048_v39 = vpop.permute.xlu0 %1047  ;;  %v2334_v50 = vpack.c.bf16 %v1514_v44, %v1507_v49 }
 0x202   : > { %v1061_v40 = vsel %vm4270_vm15, %v1046_v30, %v1048_v39 }
 0x203   : > { %1075 = vst [vmem:[#allocation2 + $0x1c8] sm:$0xf] %v1061_v40  ;;  %v1122_v41 = vpop.permute.xlu1 %1121  ;;  %1430 = vrot.lane.b32.xlu0 %v3252_v2, %s2898_s8 }
 0x205   : > { %599 = vrot.lane.b32.xlu1 %v3400_v11, %s2876_s22  ;;  %v1086_v43 = vpop.permute.xlu0 %1085 }
 0x206   : > { %v1099_v8 = vsel %vm4267_vm13, %v1084_v38, %v1086_v43  ;;  %v1515_v46 = vld [vmem:[#allocation2 + $0x1a0] sm:$0xff] }
 0x207   : > { %1113 = vst [vmem:[#allocation2 + $0x1c8] sm:$0xf0] %v1099_v8  ;;  %v1161_v47 = vpop.permute.xlu1 %1160  ;;  %597 = vrot.lane.b32.xlu0 %v3269_v5, %s2876_s22  ;;  %v2332_v48 = vpack.c.bf16 %v1515_v46, %v1508_v45 }
 0x209   : > { %637 = vrot.lane.b32.xlu1 %v3615_v58, %s2877_s14  ;;  %2333 = vmatprep.subr.bf16.mxu1 %v2332_v48  ;;  %v1124_v2 = vpop.permute.xlu0 %1123 }
 0x20a   : > { %v1137_v6 = vsel %vm4268_vm14, %v1122_v41, %v1124_v2  ;;  %2335 = vmatpush1.bf16.msra.mxu1 %v2334_v50 }
 0x20b   : > { %1151 = vst [vmem:[#allocation2 + $0x200] sm:$0xf] %v1137_v6  ;;  %v1044_v51 = vpop.permute.xlu1 %1043  ;;  %635 = vrot.lane.b32.xlu0 %v3269_v5, %s2877_s14 }
 0x20c   : > { %v1060_v52 = vsel %vm4270_vm15, %v1044_v51, %v1046_v30 }
 0x20d   : > { %1074 = vst [vmem:[#allocation2 + $0x1c0] sm:$0xf] %v1060_v52  ;;  %675 = vrot.lane.b32.xlu1 %v3400_v11, %s2878_s12  ;;  %v1163_v53 = vpop.permute.xlu0 %1162 }
 0x20e   : > { %v1176_v54 = vsel %vm4269_vm12, %v1161_v47, %v1163_v53  ;;  %v1520_v9 = vld [vmem:[#allocation2 + $0x1c8] sm:$0xff] }
 0x20f   : > { %1190 = vst [vmem:[#allocation2 + $0x200] sm:$0xf0] %v1176_v54  ;;  %v1120_v0 = vpop.permute.xlu1 %1119  ;;  %673 = vrot.lane.b32.xlu0 %v3269_v5, %s2878_s12 }
 0x210   : > { %v1136_v55 = vsel %vm4268_vm14, %v1120_v0, %v1122_v41 }
 0x211   : > { %1150 = vst [vmem:[#allocation2 + $0x1f8] sm:$0xf] %v1136_v55  ;;  %713 = vrot.lane.b32.xlu1 %v3615_v58, %s2879_s3  ;;  %v1082_v57 = vpop.permute.xlu0 %1081 }
 0x212   : > { %v1098_v59 = vsel %vm4267_vm13, %v1082_v57, %v1084_v38 }
 0x213   : > { %1112 = vst [vmem:[#allocation2 + $0x1c0] sm:$0xf0] %v1098_v59  ;;  %v1050_v60 = vpop.permute.xlu1 %1049  ;;  %711 = vrot.lane.b32.xlu0 %v3269_v5, %s2879_s3 }
 0x214   : > { %v1062_v3 = vsel %vm4270_vm15, %v1048_v39, %v1050_v60 }
 0x215   : > { %1076 = vst [vmem:[#allocation2 + $0x1d0] sm:$0xf] %v1062_v3  ;;  %525 = vrot.lane.b32.xlu1 %v3686_v56, %s2873_s16  ;;  %v1159_v62 = vpop.permute.xlu0 %1158  ;;  %s4307_s16 = smov 16  }
 0x216   : > { %v1175_v63 = vsel %vm4269_vm12, %v1159_v62, %v1161_v47  ;;  %v1527_v10 = vld [vmem:[#allocation2 + $0x200] sm:$0xff] }
 0x217   : > { %1189 = vst [vmem:[#allocation2 + $0x1f8] sm:$0xf0] %v1175_v63  ;;  %v1088_v12 = vpop.permute.xlu1 %1087  ;;  %487 = vrot.lane.b32.xlu0 %v3694_v61, %s2874_s30  ;;  %v2306_v13 = vpack.c.bf16 %v1527_v10, %v1520_v9  ;;  %s4308_s30 = smov 8  }
 0x218   : > { %v1100_v14 = vsel %vm4267_vm13, %v1086_v43, %v1088_v12 }
 0x219   : > { %1114 = vst [vmem:[#allocation2 + $0x1d0] sm:$0xf0] %v1100_v14  ;;  %749 = vrot.lane.b32.xlu1 %v3269_v5, %s2880_s23  ;;  %v3705_v15 = vpop.permute.xlu0 %1051  ;;  %2307 = vmatprep.subr.bf16.mxu0 %v2306_v13 }
 0x21a   : > { %v1063_v16 = vsel %vm4270_vm15, %v1050_v60, %v3705_v15  ;;  %v1519_v25 = vld [vmem:[#allocation2 + $0x1c0] sm:$0xff]  ;;  %vm4272_vm15 = vcmask 359424  }
 0x21b   : > { %1077 = vst [vmem:[#allocation2 + $0x1d8] sm:$0xf] %v1063_v16  ;;  %v1126_v19 = vpop.permute.xlu1 %1125  ;;  %563 = vrot.lane.b32.xlu0 %v3694_v61, %s2875_s10  ;;  %s4309_s10 = smov 7  }
 0x21c   : > { %v1138_v22 = vsel %vm4268_vm14, %v1124_v2, %v1126_v19 }
 0x21d   : > { %1152 = vst [vmem:[#allocation2 + $0x208] sm:$0xf] %v1138_v22  ;;  %787 = vrot.lane.b32.xlu1 %v3269_v5, %s2881_s11  ;;  %v3714_v23 = vpop.permute.xlu0 %1089 }
 0x21e   : > { %v1101_v7 = vsel %vm4267_vm13, %v1088_v12, %v3714_v23  ;;  %v1526_v26 = vld [vmem:[#allocation2 + $0x1f8] sm:$0xff]  ;;  %vm4274_vm13 = vcmask 441344  }
 0x21f   : > { %1115 = vst [vmem:[#allocation2 + $0x1d8] sm:$0xf0] %v1101_v7  ;;  %v1165_v29 = vpop.permute.xlu1 %1164  ;;  %751 = vrot.lane.b32.xlu0 %v3400_v11, %s2880_s23  ;;  %v2308_v30 = vpack.c.bf16 %v1526_v26, %v1519_v25 }
 0x220   : > { %v1177_v37 = vsel %vm4269_vm12, %v1163_v53, %v1165_v29  ;;  %v1521_v52 = vld [vmem:[#allocation2 + $0x1d0] sm:$0xff] }
 0x221   : > { %1191 = vst [vmem:[#allocation2 + $0x208] sm:$0xf0] %v1177_v37  ;;  %825 = vrot.lane.b32.xlu1 %v3269_v5, %s2882_s21  ;;  %v3723_v38 = vpop.permute.xlu0 %1127  ;;  %2309 = vmatpush1.bf16.msra.mxu0 %v2308_v30 }
 0x222   : > { %v1139_v39 = vsel %vm4268_vm14, %v1126_v19, %v3723_v38  ;;  %vm4271_vm14 = vcmask 375808  }
 0x223   : > { %1153 = vst [vmem:[#allocation2 + $0x210] sm:$0xf] %v1139_v39  ;;  %v1199_v40 = vpop.permute.xlu1 %1198  ;;  %789 = vrot.lane.b32.xlu0 %v3615_v58, %s2881_s11 }
 0x225   : > { %863 = vrot.lane.b32.xlu1 %v3269_v5, %s2883_s17  ;;  %v3731_v41 = vpop.permute.xlu0 %1166 }
 0x226   : > { %v1178_v43 = vsel %vm4269_vm12, %v1165_v29, %v3731_v41  ;;  %v1522_v50 = vld [vmem:[#allocation2 + $0x1d8] sm:$0xff]  ;;  %vm4273_vm12 = vcmask 367616  }
 0x227   : > { %1192 = vst [vmem:[#allocation2 + $0x210] sm:$0xf0] %v1178_v43  ;;  %v1237_v44 = vpop.permute.xlu1 %1236  ;;  %827 = vrot.lane.b32.xlu0 %v3400_v11, %s2882_s21 }
 0x228   : > { %v1528_v48 = vld [vmem:[#allocation2 + $0x208] sm:$0xff] }
 0x229   : > { %601 = vrot.lane.b32.xlu1 %v3686_v56, %s2876_s22  ;;  %v1201_v8 = vpop.permute.xlu0 %1200  ;;  %v2338_v53 = vpack.c.bf16 %v1528_v48, %v1521_v52  ;;  %s4310_s22 = smov 6  }
 0x22a   : > { %v1214_v45 = vsel %vm4274_vm13, %v1199_v40, %v1201_v8 }
 0x22b   : > { %1228 = vst [vmem:[#allocation2 + $0x238] sm:$0xf] %v1214_v45  ;;  %v1275_v46 = vpop.permute.xlu1 %1274  ;;  %865 = vrot.lane.b32.xlu0 %v3615_v58, %s2883_s17 }
 0x22d   : > { %677 = vrot.lane.b32.xlu1 %v3686_v56, %s2878_s12  ;;  %v1239_v47 = vpop.permute.xlu0 %1238  ;;  %s4312_s12 = smov 55  }
 0x22e   : > { %v1252_v49 = vsel %vm4271_vm14, %v1237_v44, %v1239_v47  ;;  %v1529_v2 = vld [vmem:[#allocation2 + $0x210] sm:$0xff] }
 0x22f   : > { %1266 = vst [vmem:[#allocation2 + $0x238] sm:$0xf0] %v1252_v49  ;;  %v1313_v6 = vpop.permute.xlu1 %1312  ;;  %639 = vrot.lane.b32.xlu0 %v3694_v61, %s2877_s14  ;;  %v2336_v51 = vpack.c.bf16 %v1529_v2, %v1522_v50  ;;  %s4311_s14 = smov 56  }
 0x231   : > { %901 = vrot.lane.b32.xlu1 %v3269_v5, %s2884_s4  ;;  %2337 = vmatprep.subr.bf16.mxu1 %v2336_v51  ;;  %v1277_v54 = vpop.permute.xlu0 %1276 }
 0x232   : > { %v1290_v0 = vsel %vm4273_vm12, %v1275_v46, %v1277_v54  ;;  %2339 = vmatpush1.bf16.msra.mxu1 %v2338_v53 }
 0x233   : > { %1304 = vst [vmem:[#allocation2 + $0x270] sm:$0xf] %v1290_v0  ;;  %v1197_v55 = vpop.permute.xlu1 %1196  ;;  %715 = vrot.lane.b32.xlu0 %v3694_v61, %s2879_s3  ;;  %s4313_s3 = smov 54  }
 0x234   : > { %v1213_v57 = vsel %vm4274_vm13, %v1197_v55, %v1199_v40 }
 0x235   : > { %1227 = vst [vmem:[#allocation2 + $0x230] sm:$0xf] %v1213_v57  ;;  %939 = vrot.lane.b32.xlu1 %v3269_v5, %s4306_s15  ;;  %v1315_v59 = vpop.permute.xlu0 %1314 }
 0x236   : > { %v1328_v60 = vsel %vm4272_vm15, %v1313_v6, %v1315_v59  ;;  %v1534_v16 = vld [vmem:[#allocation2 + $0x238] sm:$0xff] }
 0x237   : > { %1342 = vst [vmem:[#allocation2 + $0x270] sm:$0xf0] %v1328_v60  ;;  %v1273_v3 = vpop.permute.xlu1 %1272  ;;  %903 = vrot.lane.b32.xlu0 %v3400_v11, %s2884_s4 }
 0x238   : > { %v1289_v62 = vsel %vm4273_vm12, %v1273_v3, %v1275_v46 }
 0x239   : > { %1303 = vst [vmem:[#allocation2 + $0x268] sm:$0xf] %v1289_v62  ;;  %977 = vrot.lane.b32.xlu1 %v3269_v5, %s4307_s16  ;;  %v1235_v63 = vpop.permute.xlu0 %1234 }
 0x23a   : > { %v1251_v9 = vsel %vm4271_vm14, %v1235_v63, %v1237_v44 }
 0x23b   : > { %1265 = vst [vmem:[#allocation2 + $0x230] sm:$0xf0] %v1251_v9  ;;  %v1203_v10 = vpop.permute.xlu1 %1202  ;;  %941 = vrot.lane.b32.xlu0 %v3615_v58, %s4306_s15 }
 0x23c   : > { %v1215_v12 = vsel %vm4274_vm13, %v1201_v8, %v1203_v10 }
 0x23d   : > { %1229 = vst [vmem:[#allocation2 + $0x240] sm:$0xf] %v1215_v12  ;;  %1015 = vrot.lane.b32.xlu1 %v3269_v5, %s4308_s30  ;;  %v1311_v13 = vpop.permute.xlu0 %1310 }
 0x23e   : > { %v1327_v14 = vsel %vm4272_vm15, %v1311_v13, %v1313_v6  ;;  %v1541_v19 = vld [vmem:[#allocation2 + $0x270] sm:$0xff] }
 0x23f   : > { %1341 = vst [vmem:[#allocation2 + $0x268] sm:$0xf0] %v1327_v14  ;;  %v1241_v22 = vpop.permute.xlu1 %1240  ;;  %979 = vrot.lane.b32.xlu0 %v3400_v11, %s4307_s16  ;;  %v2310_v7 = vpack.c.bf16 %v1541_v19, %v1534_v16 }
 0x240   : > { %v1253_v25 = vsel %vm4271_vm14, %v1239_v47, %v1241_v22 }
 0x241   : > { %1267 = vst [vmem:[#allocation2 + $0x240] sm:$0xf0] %v1253_v25  ;;  %753 = vrot.lane.b32.xlu1 %v3686_v56, %s2880_s23  ;;  %v3773_v26 = vpop.permute.xlu0 %1204  ;;  %2311 = vmatprep.subr.bf16.mxu0 %v2310_v7  ;;  %s4316_s23 = smov 46  }
 0x242   : > { %v1216_v29 = vsel %vm4274_vm13, %v1203_v10, %v3773_v26  ;;  %v1533_v43 = vld [vmem:[#allocation2 + $0x230] sm:$0xff]  ;;  %vm1570_vm13 = vcmask 1043456  }
 0x243   : > { %1230 = vst [vmem:[#allocation2 + $0x248] sm:$0xf] %v1216_v29  ;;  %v1279_v30 = vpop.permute.xlu1 %1278  ;;  %1017 = vrot.lane.b32.xlu0 %v3615_v58, %s4308_s30  ;;  %vm3844_vm10 = vmpackc.low %vm1570_vm13, %vm2900_vm11  ;;  %vm4321_vm11 = vcmask 138240  }
 0x244   : > { %v1291_v37 = vsel %vm4273_vm12, %v1277_v54, %v1279_v30  ;;  %vm4324_vm13 = vmmov %vm4321_vm11 }
 0x245   : > { %1305 = vst [vmem:[#allocation2 + $0x278] sm:$0xf] %v1291_v37  ;;  %829 = vrot.lane.b32.xlu1 %v3686_v56, %s2882_s21  ;;  %v3782_v39 = vpop.permute.xlu0 %1242  ;;  %s2406_s21 = smul.u32 56, %s3216_s5 }
 0x246   : > { %v1254_v40 = vsel %vm4271_vm14, %v1241_v22, %v3782_v39  ;;  %v1540_v44 = vld [vmem:[#allocation2 + $0x268] sm:$0xff]  ;;  %vm1364_vm14 = vcmask 293888  }
 0x247   : > { %1268 = vst [vmem:[#allocation2 + $0x248] sm:$0xf0] %v1254_v40  ;;  %v1317_v8 = vpop.permute.xlu1 %1316  ;;  %791 = vrot.lane.b32.xlu0 %v3694_v61, %s2881_s11  ;;  %v2312_v45 = vpack.c.bf16 %v1540_v44, %v1533_v43  ;;  %s4317_s11 = smov 44  }
 0x248   : > { %v1329_v46 = vsel %vm4272_vm15, %v1315_v59, %v1317_v8  ;;  %v1535_v3 = vld [vmem:[#allocation2 + $0x240] sm:$0xff] }
 0x249   : > { %1343 = vst [vmem:[#allocation2 + $0x278] sm:$0xf0] %v1329_v46  ;;  %1053 = vrot.lane.b32.xlu1 %v3269_v5, %s4309_s10  ;;  %v3791_v47 = vpop.permute.xlu0 %1280  ;;  %2313 = vmatpush1.bf16.msra.mxu0 %v2312_v45 }
 0x24a   : > { %v1292_v48 = vsel %vm4273_vm12, %v1279_v30, %v3791_v47  ;;  %vm1440_vm12 = vcmask 277504  }
 0x24b   : > { %1306 = vst [vmem:[#allocation2 + $0x280] sm:$0xf] %v1292_v48  ;;  %v1351_v49 = vpop.permute.xlu1 %1350  ;;  %867 = vrot.lane.b32.xlu0 %v3694_v61, %s2883_s17  ;;  %s2407_s17 = smul.u32 896, %s2856_s27 }
 0x24d   : > { %1091 = vrot.lane.b32.xlu1 %v3269_v5, %s4310_s22  ;;  %v3799_v50 = vpop.permute.xlu0 %1318 }
 0x24e   : > { %v1330_v2 = vsel %vm4272_vm15, %v1317_v8, %v3799_v50  ;;  %vm1402_vm15 = vcmask 285696   ;;  %v1536_v55 = vld [vmem:[#allocation2 + $0x248] sm:$0xff] }
 0x24f   : > { %1344 = vst [vmem:[#allocation2 + $0x280] sm:$0xf0] %v1330_v2  ;;  %v1389_v6 = vpop.permute.xlu1 %1388  ;;  %1055 = vrot.lane.b32.xlu0 %v3400_v11, %s4309_s10 }
 0x250   : > { %v1542_v54 = vld [vmem:[#allocation2 + $0x278] sm:$0xff] }
 0x251   : > { %1129 = vrot.lane.b32.xlu1 %v3400_v11, %s4311_s14  ;;  %v3807_v51 = vpop.permute.xlu0 %1352  ;;  %v2342_v63 = vpack.c.bf16 %v1542_v54, %v1535_v3 }
 0x252   : > { %v1366_v52 = vsel %vm1364_vm14, %v1351_v49, %v3807_v51 }
 0x253   : > { %1380 = vst [vmem:[#allocation2 + $0x2a8] sm:$0xf] %v1366_v52  ;;  %v1427_v5 = vpop.permute.xlu1 %1426  ;;  %1093 = vrot.lane.b32.xlu0 %v3615_v58, %s4310_s22 }
 0x255   : > { %1168 = vrot.lane.b32.xlu1 %v3615_v58, %s4312_s12  ;;  %v3815_v53 = vpop.permute.xlu0 %1390 }
 0x256   : > { %v1404_v0 = vsel %vm1402_vm15, %v1389_v6, %v3815_v53  ;;  %v1543_v57 = vld [vmem:[#allocation2 + $0x280] sm:$0xff] }
 0x257   : > { %1418 = vst [vmem:[#allocation2 + $0x2a8] sm:$0xf0] %v1404_v0  ;;  %v1349_v59 = vpop.permute.xlu1 %1348  ;;  %1131 = vrot.lane.b32.xlu0 %v3686_v56, %s4311_s14  ;;  %v2340_v60 = vpack.c.bf16 %v1543_v57, %v1536_v55 }
 0x258   : > { %v1365_v62 = vsel %vm1364_vm14, %v1349_v59, %v1351_v49  ;;  %v3895_v59 = vcombine.high %v3686_v56, %v3686_v56 }
 0x259   : > { %1379 = vst [vmem:[#allocation2 + $0x2a0] sm:$0xf] %v1365_v62  ;;  %905 = vrot.lane.b32.xlu1 %v3686_v56, %s2884_s4  ;;  %2341 = vmatprep.subr.bf16.mxu1 %v2340_v60  ;;  %v3824_v9 = vpop.permute.xlu0 %1428  ;;  %s429_s4 = scalar_lea.vmem [#allocation15], %s2406_s21 }
 0x25a   : > { %v1442_v10 = vsel %vm1440_vm12, %v1427_v5, %v3824_v9  ;;  %2343 = vmatpush1.bf16.msra.mxu1 %v2342_v63 }
 0x25b   : > { %1456 = vst [vmem:[#allocation2 + $0x2e0] sm:$0xf] %v1442_v10  ;;  %v1425_v12 = vpop.permute.xlu1 %1424  ;;  %1170 = vrot.lane.b32.xlu0 %v3694_v61, %s4312_s12 }
 0x25c   : > { %v1441_v13 = vsel %vm1440_vm12, %v1425_v12, %v1427_v5 }
 0x25d   : > { %1455 = vst [vmem:[#allocation2 + $0x2d8] sm:$0xf] %v1441_v13  ;;  %981 = vrot.lane.b32.xlu1 %v3686_v56, %s4307_s16  ;;  %v1387_v14 = vpop.permute.xlu0 %1386  ;;  %s2904_s16 = smov [#allocation15]  }
 0x25e   : > { %v1403_v16 = vsel %vm1402_vm15, %v1387_v14, %v1389_v6  ;;  %v1548_v29 = vld [vmem:[#allocation2 + $0x2a8] sm:$0xff] }
 0x25f   : > { %1417 = vst [vmem:[#allocation2 + $0x2a0] sm:$0xf0] %v1403_v16  ;;  %v3834_v19 = vpop.permute.xlu1 %485  ;;  %943 = vrot.lane.b32.xlu0 %v3694_v61, %s4306_s15 }
 0x261   : > { %1206 = vrot.lane.b32.xlu1 %v3400_v11, %s4313_s3  ;;  %v484_v22 = vpop.permute.xlu0 %483 }
 0x262   : > { %v494_v7 = vsel %vm489_vm1, %v3431_v32, %v484_v22  ;;  %v495_v25 = vsel %vm489_vm1, %v484_v22, %v3834_v19  ;;  %v1555_v30 = vld [vmem:[#allocation2 + $0x2e0] sm:$0xf] }
 0x263   : > { %508 = vst [vmem:[#allocation2 + $0x20] sm:$0xf0] %v494_v7  ;;  %509 = vst [vmem:[#allocation2 + $0x28] sm:$0xf0] %v495_v25  ;;  %v3848_v40 = vpop.permute.xlu1 %523  ;;  %1019 = vrot.lane.b32.xlu0 %v3694_v61, %s4308_s30  ;;  %v2314_v43 = vpack.c.bf16 %v1555_v30, %v1548_v29  ;;  %s2770_s30 = sshll.u32 %s2904_s16, 4  ;;  %s2771_s30 = int_to_ptr.vmem [resolvable:$false] %s2770_s30 }
 0x264   : > { %v1554_v46 = vld [vmem:[#allocation2 + $0x2d8] sm:$0xf] }
 0x265   : > { %1244 = vrot.lane.b32.xlu1 %v3615_v58, %s4316_s23  ;;  %v522_v32 = vpop.permute.xlu0 %521  ;;  %2316 = vmatprep.subr.msk.bf16.mxu0 %vm3844_vm10, %v2314_v43 }
 0x266   : > { %v532_v44 = vsel %vm527_vm0, %v3440_v36, %v522_v32  ;;  %v533_v8 = vsel %vm527_vm0, %v522_v32, %v3848_v40  ;;  %v1547_v45 = vld [vmem:[#allocation2 + $0x2a0] sm:$0xff] }
 0x267   : > { %546 = vst [vmem:[#allocation2 + $0x58] sm:$0xf] %v532_v44  ;;  %547 = vst [vmem:[#allocation2 + $0x60] sm:$0xf] %v533_v8  ;;  %v3860_v48 = vpop.permute.xlu1 %561  ;;  %1208 = vrot.lane.b32.xlu0 %v3686_v56, %s4313_s3  ;;  %v2317_v49 = vpack.c.bf16 %v1554_v46, %v1547_v45  ;;  %v3868_v36 = vld [vmem:[#allocation8] sm:$0xff] }
 0x269   : > { %1282 = vrot.lane.b32.xlu1 %v3400_v11, %s2894_s0  ;;  %v560_v2 = vpop.permute.xlu0 %559  ;;  %2319 = vmatpush1.bf16.msk.msra.mxu0 %vm3844_vm10, %v2317_v49 }
 0x26a   : > { %v570_v6 = vsel %vm565_vm2, %v3448_v42, %v560_v2  ;;  %v571_v52 = vsel %vm565_vm2, %v560_v2, %v3860_v48  ;;  %v1468_v60 = vld [vmem:[#allocation2 + $0x28] sm:$0xff]  ;;  %v1467_v63 = vld [vmem:[#allocation2 + $0x20] sm:$0xff] }
 0x26b   : > { %584 = vst [vmem:[#allocation2 + $0x58] sm:$0xf0] %v570_v6  ;;  %585 = vst [vmem:[#allocation2 + $0x60] sm:$0xf0] %v571_v52  ;;  %v3874_v5 = vpop.permute.xlu1 %1356  ;;  %1246 = vrot.lane.b32.xlu0 %v3694_v61, %s4316_s23 }
 0x26c   : > { %2232 = vmatmul.mubr.msk.f32.vlgmr.msra.gmra.mrb[0].mxu0 %vm679_vm5, %v3868_v36 }
 0x26d   : > { %1320 = vrot.lane.b32.xlu1 %v3615_v58, %s4317_s11  ;;  %v1355_v54 = vpop.permute.xlu0 %1354  ;;  %1798 = vmatprep.mubr.f32.mxu0 %v2899_v18 }
 0x26e   : > { %v1367_v42 = vsel %vm1364_vm14, %v3807_v51, %v1355_v54  ;;  %v1368_v0 = vsel %vm1364_vm14, %v1355_v54, %v3874_v5 }
 0x26f   : > { %1381 = vst [vmem:[#allocation2 + $0x2b0] sm:$0xf] %v1367_v42  ;;  %1382 = vst [vmem:[#allocation2 + $0x2b8] sm:$0xf] %v1368_v0  ;;  %v3887_v55 = vpop.permute.xlu1 %1394  ;;  %1284 = vrot.lane.b32.xlu0 %v3686_v56, %s2894_s0 }
 0x271   : > { %1057 = vrot.lane.b32.xlu1 %v3686_v56, %s4309_s10  ;;  %v1393_v57 = vpop.permute.xlu0 %1392  ;;  %s2772_s10 = scalar_lea.vmem %s2771_s30, 1792 }
 0x272   : > { %v1405_v51 = vsel %vm1402_vm15, %v3815_v53, %v1393_v57  ;;  %v1406_v3 = vsel %vm1402_vm15, %v1393_v57, %v3887_v55  ;;  %v1475_v62 = vld [vmem:[#allocation2 + $0x60] sm:$0xff]  ;;  %v1474_v10 = vld [vmem:[#allocation2 + $0x58] sm:$0xff] }
 0x273   : > { %1419 = vst [vmem:[#allocation2 + $0x2b0] sm:$0xf0] %v1405_v51  ;;  %1420 = vst [vmem:[#allocation2 + $0x2b8] sm:$0xf0] %v1406_v3  ;;  %v3901_v12 = vpop.permute.xlu1 %1432  ;;  %1322 = vrot.lane.b32.xlu0 %v3694_v61, %s4317_s11  ;;  %v2350_v13 = vpack.c.bf16 %v1475_v62, %v1468_v60  ;;  %v2352_v14 = vpack.c.bf16 %v1474_v10, %v1467_v63 }
 0x275   : > { %1133 = vrot.lane.b32.xlu1 %v3895_v59, %s4311_s14  ;;  %v1431_v16 = vpop.permute.xlu0 %1430  ;;  %2351 = vmatprep.subr.bf16.mxu0 %v2350_v13 }
 0x276   : > { %v1443_v53 = vsel %vm1440_vm12, %v3824_v9, %v1431_v16  ;;  %v1444_v22 = vsel %vm1440_vm12, %v1431_v16, %v3901_v12  ;;  %2353 = vmatpush1.bf16.msra.mxu0 %v2352_v14 }
 0x277   : > { %1457 = vst [vmem:[#allocation2 + $0x2e8] sm:$0xf] %v1443_v53  ;;  %1458 = vst [vmem:[#allocation2 + $0x2f0] sm:$0xf] %v1444_v22  ;;  %v3911_v7 = vpop.permute.xlu1 %599  ;;  %1095 = vrot.lane.b32.xlu0 %v3694_v61, %s4310_s22 }
 0x279   : > { %1358 = vrot.lane.b32.xlu1 %v3400_v11, %s2896_s13  ;;  %v598_v25 = vpop.permute.xlu0 %597 }
 0x27a   : > { %v608_v29 = vsel %vm603_vm3, %v3490_v21, %v598_v25  ;;  %v609_v9 = vsel %vm603_vm3, %v598_v25, %v3911_v7  ;;  %v1550_v32 = vld [vmem:[#allocation2 + $0x2b8] sm:$0xff]  ;;  %v1549_v45 = vld [vmem:[#allocation2 + $0x2b0] sm:$0xff]  ;;  %v1561_v25 = vld [vmem:[#allocation9] sm:$0xff] }
 0x27b   : > { %622 = vst [vmem:[#allocation2 + $0x90] sm:$0xf] %v608_v29  ;;  %623 = vst [vmem:[#allocation2 + $0x98] sm:$0xf] %v609_v9  ;;  %v3921_v30 = vpop.permute.xlu1 %637  ;;  %1172 = vrot.lane.b32.xlu0 %v3895_v59, %s4312_s12  ;;  %v2903_v9 = vmov 0  }
 0x27c   : > { %2557 = vset.pattern.permute.xlu0 %v2903_v9  ;;  %2558 = vset.pattern.permute.xlu1 %v2903_v9 }
 0x27d   : > { %1396 = vrot.lane.b32.xlu1 %v3615_v58, %s2897_s2  ;;  %v636_v43 = vpop.permute.xlu0 %635 }
 0x27e   : > { %v646_v44 = vsel %vm641_vm4, %v3499_v24, %v636_v43  ;;  %v647_v21 = vsel %vm641_vm4, %v636_v43, %v3921_v30  ;;  %v1557_v8 = vld [vmem:[#allocation2 + $0x2f0] sm:$0xf]  ;;  %v1556_v46 = vld [vmem:[#allocation2 + $0x2e8] sm:$0xf] }
 0x27f   : > { %660 = vst [vmem:[#allocation2 + $0x90] sm:$0xf0] %v646_v44  ;;  %661 = vst [vmem:[#allocation2 + $0x98] sm:$0xf0] %v647_v21  ;;  %v3931_v49 = vpop.permute.xlu1 %675  ;;  %1360 = vrot.lane.b32.xlu0 %v3686_v56, %s2896_s13  ;;  %v2344_v2 = vpack.c.bf16 %v1557_v8, %v1550_v32  ;;  %v2347_v58 = vpack.c.bf16 %v1556_v46, %v1549_v45 }
 0x281   : > { %1434 = vrot.lane.b32.xlu1 %v3400_v11, %s2898_s8  ;;  %2346 = vmatprep.subr.msk.bf16.mxu1 %vm3844_vm10, %v2344_v2  ;;  %v674_v24 = vpop.permute.xlu0 %673  ;;  %v2901_v11 = vmov 0.0|0.0  }
 0x282   : > { %v684_v6 = vsel %vm679_vm5, %v3508_v31, %v674_v24  ;;  %v685_v52 = vsel %vm679_vm5, %v674_v24, %v3931_v49  ;;  %2349 = vmatpush1.bf16.msk.msra.mxu1 %vm3844_vm10, %v2347_v58 }
 0x283   : > { %698 = vst [vmem:[#allocation2 + $0xc8] sm:$0xf] %v684_v6  ;;  %699 = vst [vmem:[#allocation2 + $0xd0] sm:$0xf] %v685_v52  ;;  %v3945_v54 = vpop.permute.xlu1 %713  ;;  %1398 = vrot.lane.b32.xlu0 %v3694_v61, %s2897_s2  ;;  %2380 = vmatprep.subr.bf16.mxu1 %v2901_v11 }
 0x285   : > { %1210 = vrot.lane.b32.xlu1 %v3895_v59, %s4313_s3  ;;  %v712_v31 = vpop.permute.xlu0 %711  ;;  %2235 = vmatmul.mubr.msk.f32.vlgmr.msra.gmra.mrb[0].mxu1 %vm679_vm5, %v3868_v36 }
 0x286   : > { %v722_v42 = vsel %vm717_vm6, %v3516_v35, %v712_v31  ;;  %v723_v0 = vsel %vm717_vm6, %v712_v31, %v3945_v54  ;;  %v1481_v10 = vld [vmem:[#allocation2 + $0x90] sm:$0xff] }
 0x287   : > { %736 = vst [vmem:[#allocation2 + $0xc8] sm:$0xf0] %v722_v42  ;;  %737 = vst [vmem:[#allocation2 + $0xd0] sm:$0xf0] %v723_v0  ;;  %v526_v57 = vpop.permute.xlu1 %525  ;;  %1436 = vrot.lane.b32.xlu0 %v3686_v56, %s2898_s8 }
 0x288   : > { %v534_v61 = vsel %vm527_vm0, %v3848_v40, %v526_v57  ;;  %v1482_v40 = vld [vmem:[#allocation2 + $0x98] sm:$0xff]  ;;  %vm2902_vm0 = vmmov 0  }
 0x289   : > { %548 = vst [vmem:[#allocation2 + $0x68] sm:$0xf] %v534_v61  ;;  %1286 = vrot.lane.b32.xlu1 %v3895_v59, %s2894_s0  ;;  %v488_v60 = vpop.permute.xlu0 %487  ;;  %2287 = vmatprep.mubr.msk.f32.mxu1 %vm2902_vm0, %v2899_v18  ;;  %vm4325_vm0 = vcmask 64512  }
 0x28a   : > { %v496_v35 = vsel %vm489_vm1, %v3834_v19, %v488_v60  ;;  %vm4318_vm1 = vcmask 211968  }
 0x28b   : > { %510 = vst [vmem:[#allocation2 + $0x30] sm:$0xf0] %v496_v35  ;;  %v750_v51 = vpop.permute.xlu1 %749  ;;  %1248 = vrot.lane.b32.xlu0 %v3895_v59, %s4316_s23 }
 0x28c   : > { %v760_v3 = vsel %vm755_vm7, %v3558_v17, %v750_v51 }
 0x28d   : > { %774 = vst [vmem:[#allocation2 + $0x100] sm:$0xf] %v760_v3  ;;  %1362 = vrot.lane.b32.xlu1 %v3895_v59, %s2896_s13  ;;  %v564_v56 = vpop.permute.xlu0 %563  ;;  %s2042_s13 = scalar_lea.sflag [#allocation5], %s3216_s5 }
 0x28e   : > { %v572_v62 = vsel %vm565_vm2, %v3860_v48, %v564_v56  ;;  %v1489_v63 = vld [vmem:[#allocation2 + $0xd0] sm:$0xff]  ;;  %v1488_v19 = vld [vmem:[#allocation2 + $0xc8] sm:$0xff]  ;;  %vm4319_vm2 = vmmov %vm4318_vm1 }
 0x28f   : > { %586 = vst [vmem:[#allocation2 + $0x68] sm:$0xf0] %v572_v62  ;;  %v788_v13 = vpop.permute.xlu1 %787  ;;  %1324 = vrot.lane.b32.xlu0 %v3895_v59, %s4317_s11  ;;  %v2354_v14 = vpack.c.bf16 %v1489_v63, %v1482_v40  ;;  %v2356_v16 = vpack.c.bf16 %v1488_v19, %v1481_v10 }
 0x290   : > { %v798_v17 = vsel %vm793_vm8, %v3567_v20, %v788_v13 }
 0x291   : > { %812 = vst [vmem:[#allocation2 + $0x100] sm:$0xf0] %v798_v17  ;;  %1438 = vrot.lane.b32.xlu1 %v3895_v59, %s2898_s8  ;;  %v3980_v53 = vpop.permute.xlu0 %751  ;;  %2355 = vmatprep.subr.bf16.mxu0 %v2354_v14  ;;  %s4179_s8 = scalar_lea.hbm %s4238_s7, %s2407_s17 }
 0x292   : > { %v761_v48 = vsel %vm755_vm7, %v750_v51, %v3980_v53  ;;  %2357 = vmatpush1.bf16.msra.mxu0 %v2356_v16  ;;  %v1469_v43 = vld [vmem:[#allocation2 + $0x30] sm:$0xff] }
 0x293   : > { %775 = vst [vmem:[#allocation2 + $0x108] sm:$0xf] %v761_v48  ;;  %v826_v22 = vpop.permute.xlu1 %825  ;;  %1400 = vrot.lane.b32.xlu0 %v3895_v59, %s2897_s2  ;;  %s2056_s2 = sshll.u32 %s429_s4, 4  ;;  %s4181_s2 = int_to_ptr.vmem [resolvable:$true] %s2056_s2 }
 0x294   : > { %v836_v20 = vsel %vm831_vm9, %v3576_v28, %v826_v22  ;;  %s2766_s15 = scalar_lea.vmem %s4181_s2, 896  ;;  %p2773_p11 = scmp.lt.s32.totalorder %s4181_s2, %s2771_s30 }
 0x295   : > { %850 = vst [vmem:[#allocation2 + $0x138] sm:$0xf] %v836_v20  ;;  %v3989_v29 = vpop.permute.xlu0 %789  ;;  %p2767_p6 = scmp.ne.s32.totalorder %s4181_s2, %s2766_s15  ;;  %p2774_p12 = scmp.lt.s32.totalorder %s2772_s10, %s2766_s15 }
 0x296   : > { %v799_v18 = vsel %vm793_vm8, %v788_v13, %v3989_v29  ;;  %v1476_v32 = vld [vmem:[#allocation2 + $0x68] sm:$0xff] }
 0x297   : > { %813 = vst [vmem:[#allocation2 + $0x108] sm:$0xf0] %v799_v18  ;;  %v864_v44 = vpop.permute.xlu1 %863  ;;  %v2381_v59 = vpack.c.bf16 %v1476_v32, %v1469_v43  ;;  %1564 = vperm.xlu0 %2557, %v1561_v25   ;;  %p2768_p13 = pnand %p2767_p6, %p4357_p10  ;;  %p2775_p4 = por %p2774_p12, %p2773_p11 }
 0x298   : > { %v874_v28 = vsel %vm4318_vm1, %v3584_v33, %v864_v44  ;;  %v1495_v51 = vld [vmem:[#allocation2 + $0x100] sm:$0xff] }
 0x299   : > { %888 = vst [vmem:[#allocation2 + $0x138] sm:$0xf0] %v874_v28  ;;  %2382 = vmatpush3.bf16.msra.mxu1 %v2381_v59  ;;  %v828_v21 = vpop.permute.xlu0 %827  ;;  %p2769_p2 = pneg %p2768_p13 }
 0x29a   : > { %v837_v8 = vsel %vm831_vm9, %v826_v22, %v828_v21  ;;  %2383 = vmatprep.subr.bf16.mxu1 %v2901_v11 }
 0x29b   : > { %851 = vst [vmem:[#allocation2 + $0x140] sm:$0xf] %v837_v8  ;;  %v602_v45 = vpop.permute.xlu1 %601  ;;  %p2776_p3 = pnand %p2775_p4, %p2769_p2 }
 0x29c   : > { %v610_v46 = vsel %vm603_vm3, %v3911_v7, %v602_v45  ;;  %vm4320_vm3 = vcmask 146432  }
 0x29d   : > { %624 = vst [vmem:[#allocation2 + $0xa0] sm:$0xf] %v610_v46  ;;  %v4001_v2 = vpop.permute.xlu0 %865 }
 0x29e   : > { %v875_v58 = vsel %vm4319_vm2, %v864_v44, %v4001_v2  ;;  %v1496_v61 = vld [vmem:[#allocation2 + $0x108] sm:$0xff]  ;;  %vm4327_vm2 = vmmov %vm4325_vm0 }
 0x29f   : > { %889 = vst [vmem:[#allocation2 + $0x140] sm:$0xf0] %v875_v58  ;;  %v678_v33 = vpop.permute.xlu1 %677 }
 0x2a0   : > { %v686_v24 = vsel %vm679_vm5, %v3931_v49, %v678_v33  ;;  %v1502_v0 = vld [vmem:[#allocation2 + $0x138] sm:$0xff] }
 0x2a1   : > { %700 = vst [vmem:[#allocation2 + $0xd8] sm:$0xf] %v686_v24  ;;  %v640_v6 = vpop.permute.xlu0 %639  ;;  %v2360_v3 = vpack.c.bf16 %v1502_v0, %v1495_v51 }
 0x2a2   : > { %v648_v52 = vsel %vm641_vm4, %v3921_v30, %v640_v6  ;;  %vm4322_vm4 = vmmov %vm4320_vm3 }
 0x2a3   : > { %662 = vst [vmem:[#allocation2 + $0xa0] sm:$0xf0] %v648_v52  ;;  %v902_v31 = vpop.permute.xlu1 %901 }
 0x2a4   : > { %v912_v7 = vsel %vm4320_vm3, %v3629_v4, %v902_v31  ;;  %vm4328_vm3 = vcmask 56320  }
 0x2a5   : > { %926 = vst [vmem:[#allocation2 + $0x170] sm:$0xf] %v912_v7  ;;  %v716_v42 = vpop.permute.xlu0 %715 }
 0x2a6   : > { %v724_v57 = vsel %vm717_vm6, %v3945_v54, %v716_v42  ;;  %v1503_v60 = vld [vmem:[#allocation2 + $0x140] sm:$0xff]  ;;  %vm4323_vm6 = vcmask 130048  }
 0x2a7   : > { %738 = vst [vmem:[#allocation2 + $0xd8] sm:$0xf0] %v724_v57  ;;  %v940_v49 = vpop.permute.xlu1 %939  ;;  %v2358_v35 = vpack.c.bf16 %v1503_v60, %v1496_v61  ;;  %vm4326_vm1 = vmmov %vm4323_vm6 }
 0x2a8   : > { %v950_v30 = vsel %vm4321_vm11, %v3640_v1, %v940_v49  ;;  %vm4332_vm11 = vcmask 457728  }
 0x2a9   : > { %964 = vst [vmem:[#allocation2 + $0x170] sm:$0xf0] %v950_v30  ;;  %v4015_v56 = vpop.permute.xlu0 %903  ;;  %2359 = vmatprep.subr.bf16.mxu0 %v2358_v35 }
 0x2aa   : > { %v913_v4 = vsel %vm4322_vm4, %v902_v31, %v4015_v56  ;;  %2361 = vmatpush1.bf16.msra.mxu0 %v2360_v3  ;;  %v1483_v63 = vld [vmem:[#allocation2 + $0xa0] sm:$0xff] }
 0x2ab   : > { %927 = vst [vmem:[#allocation2 + $0x178] sm:$0xf] %v913_v4  ;;  %v978_v54 = vpop.permute.xlu1 %977 }
 0x2ac   : > { %v988_v40 = vsel %vm4323_vm6, %v3649_v27, %v978_v54  ;;  %vm4334_vm6 = vcmask 449536  }
 0x2ad   : > { %1002 = vst [vmem:[#allocation2 + $0x1a8] sm:$0xf] %v988_v40  ;;  %v4021_v62 = vpop.permute.xlu0 %941 }
 0x2ae   : > { %v951_v1 = vsel %vm4324_vm13, %v940_v49, %v4021_v62  ;;  %v1490_v10 = vld [vmem:[#allocation2 + $0xd8] sm:$0xff]  ;;  %vm4335_vm13 = vmmov %vm4332_vm11 }
 0x2af   : > { %965 = vst [vmem:[#allocation2 + $0x178] sm:$0xf0] %v951_v1  ;;  %v1016_v19 = vpop.permute.xlu1 %1015  ;;  %v2384_v13 = vpack.c.bf16 %v1490_v10, %v1483_v63 }
 0x2b0   : > { %v1026_v14 = vsel %vm4325_vm0, %v3657_v34, %v1016_v19  ;;  %v1509_v58 = vld [vmem:[#allocation2 + $0x170] sm:$0xff]  ;;  %vm4336_vm0 = vcmask 146432  }
 0x2b1   : > { %1040 = vst [vmem:[#allocation2 + $0x1a8] sm:$0xf0] %v1026_v14  ;;  %2385 = vmatpush3.bf16.msra.mxu1 %v2384_v13  ;;  %v980_v16 = vpop.permute.xlu0 %979 }
 0x2b2   : > { %v989_v17 = vsel %vm4326_vm1, %v978_v54, %v980_v16  ;;  %2386 = vmatprep.subr.bf16.mxu1 %v2901_v11  ;;  %vm4337_vm1 = vmmov %vm4334_vm6 }
 0x2b3   : > { %1003 = vst [vmem:[#allocation2 + $0x1b0] sm:$0xf] %v989_v17  ;;  %v754_v27 = vpop.permute.xlu1 %753 }
 0x2b4   : > { %v762_v48 = vsel %vm755_vm7, %v3980_v53, %v754_v27  ;;  %vm4329_vm7 = vcmask 211968  }
 0x2b5   : > { %776 = vst [vmem:[#allocation2 + $0x110] sm:$0xf] %v762_v48  ;;  %v4031_v22 = vpop.permute.xlu0 %1017 }
 0x2b6   : > { %v1027_v20 = vsel %vm4327_vm2, %v1016_v19, %v4031_v22  ;;  %v1510_v8 = vld [vmem:[#allocation2 + $0x178] sm:$0xff]  ;;  %vm4338_vm2 = vcmask 130048  }
 0x2b7   : > { %1041 = vst [vmem:[#allocation2 + $0x1b0] sm:$0xf0] %v1027_v20  ;;  %v830_v34 = vpop.permute.xlu1 %829 }
 0x2b8   : > { %v838_v25 = vsel %vm831_vm9, %v828_v21, %v830_v34  ;;  %v1516_v59 = vld [vmem:[#allocation2 + $0x1a8] sm:$0xff]  ;;  %vm4330_vm9 = vcmask 48128  }
 0x2b9   : > { %852 = vst [vmem:[#allocation2 + $0x148] sm:$0xf] %v838_v25  ;;  %v792_v18 = vpop.permute.xlu0 %791  ;;  %v2364_v33 = vpack.c.bf16 %v1516_v59, %v1509_v58  ;;  %vm4333_vm4 = vmmov %vm4330_vm9 }
 0x2ba   : > { %v800_v43 = vsel %vm793_vm8, %v3989_v29, %v792_v18  ;;  %vm4331_vm8 = vmmov %vm4328_vm3 }
 0x2bb   : > { %814 = vst [vmem:[#allocation2 + $0x110] sm:$0xf0] %v800_v43  ;;  %v1054_v32 = vpop.permute.xlu1 %1053 }
 0x2bc   : > { %v1064_v53 = vsel %vm4328_vm3, %v3705_v15, %v1054_v32  ;;  %vm4339_vm3 = vcmask 138240  }
 0x2bd   : > { %1078 = vst [vmem:[#allocation2 + $0x1e0] sm:$0xf] %v1064_v53  ;;  %v868_v44 = vpop.permute.xlu0 %867 }
 0x2be   : > { %v876_v28 = vsel %vm4329_vm7, %v4001_v2, %v868_v44  ;;  %v1517_v45 = vld [vmem:[#allocation2 + $0x1b0] sm:$0xff]  ;;  %vm4340_vm7 = vcmask 441344  }
 0x2bf   : > { %890 = vst [vmem:[#allocation2 + $0x148] sm:$0xf0] %v876_v28  ;;  %v1092_v21 = vpop.permute.xlu1 %1091  ;;  %v2362_v46 = vpack.c.bf16 %v1517_v45, %v1510_v8 }
 0x2c0   : > { %v1102_v29 = vsel %vm4330_vm9, %v3714_v23, %v1092_v21  ;;  %vm4341_vm9 = vcmask 64512  }
 0x2c1   : > { %1116 = vst [vmem:[#allocation2 + $0x1e0] sm:$0xf0] %v1102_v29  ;;  %v4044_v24 = vpop.permute.xlu0 %1055  ;;  %2363 = vmatprep.subr.bf16.mxu0 %v2362_v46 }
 0x2c2   : > { %v1065_v15 = vsel %vm4331_vm8, %v1054_v32, %v4044_v24  ;;  %2365 = vmatpush1.bf16.msra.mxu0 %v2364_v33  ;;  %v1497_v31 = vld [vmem:[#allocation2 + $0x110] sm:$0xff]  ;;  %vm4342_vm8 = vcmask 375808  }
 0x2c3   : > { %1079 = vst [vmem:[#allocation2 + $0x1e8] sm:$0xf] %v1065_v15  ;;  %v1130_v2 = vpop.permute.xlu1 %1129 }
 0x2c4   : > { %v1140_v6 = vsel %vm4332_vm11, %v3723_v38, %v1130_v2  ;;  %vm4343_vm11 = vmmov %vm4340_vm7 }
 0x2c5   : > { %1154 = vst [vmem:[#allocation2 + $0x218] sm:$0xf] %v1140_v6  ;;  %v4050_v52 = vpop.permute.xlu0 %1093 }
 0x2c6   : > { %v1103_v23 = vsel %vm4333_vm4, %v1092_v21, %v4050_v52  ;;  %v1504_v7 = vld [vmem:[#allocation2 + $0x148] sm:$0xff]  ;;  %vm4344_vm4 = vcmask 367616  }
 0x2c7   : > { %1117 = vst [vmem:[#allocation2 + $0x1e8] sm:$0xf0] %v1103_v23  ;;  %v1169_v42 = vpop.permute.xlu1 %1168  ;;  %v2387_v0 = vpack.c.bf16 %v1504_v7, %v1497_v31 }
 0x2c8   : > { %v1179_v57 = vsel %vm4334_vm6, %v3731_v41, %v1169_v42  ;;  %vm4345_vm6 = vmmov %vm4342_vm8 }
 0x2c9   : > { %1193 = vst [vmem:[#allocation2 + $0x218] sm:$0xf0] %v1179_v57  ;;  %2388 = vmatpush3.bf16.msra.mxu1 %v2387_v0  ;;  %v1132_v61 = vpop.permute.xlu0 %1131 }
 0x2ca   : > { %v1141_v60 = vsel %vm4335_vm13, %v1130_v2, %v1132_v61  ;;  %2389 = vmatprep.subr.bf16.mxu1 %v2901_v11  ;;  %vm4346_vm13 = vcmask 359424  }
 0x2cb   : > { %1155 = vst [vmem:[#allocation2 + $0x220] sm:$0xf] %v1141_v60  ;;  %v906_v38 = vpop.permute.xlu1 %905 }
 0x2cc   : > { %v914_v49 = vsel %vm4336_vm0, %v4015_v56, %v906_v38  ;;  %vm4347_vm0 = vmmov %vm4344_vm4 }
 0x2cd   : > { %928 = vst [vmem:[#allocation2 + $0x180] sm:$0xf] %v914_v49  ;;  %v4060_v35 = vpop.permute.xlu0 %1170 }
 0x2ce   : > { %v1180_v51 = vsel %vm4337_vm1, %v1169_v42, %v4060_v35  ;;  %v1524_v10 = vld [vmem:[#allocation2 + $0x1e8] sm:$0xff]  ;;  %vm4348_vm1 = vcmask 56320  }
 0x2cf   : > { %1194 = vst [vmem:[#allocation2 + $0x220] sm:$0xf0] %v1180_v51  ;;  %v982_v41 = vpop.permute.xlu1 %981 }
 0x2d0   : > { %v990_v30 = vsel %vm4338_vm2, %v980_v16, %v982_v41  ;;  %v1530_v1 = vld [vmem:[#allocation2 + $0x218] sm:$0xff]  ;;  %v1523_v16 = vld [vmem:[#allocation2 + $0x1e0] sm:$0xff]  ;;  %vm4349_vm2 = vmmov %vm4346_vm13 }
 0x2d1   : > { %1004 = vst [vmem:[#allocation2 + $0x1b8] sm:$0xf] %v990_v30  ;;  %v944_v3 = vpop.permute.xlu0 %943  ;;  %v2368_v17 = vpack.c.bf16 %v1530_v1, %v1523_v16 }
 0x2d2   : > { %v952_v4 = vsel %vm4339_vm3, %v4021_v62, %v944_v3  ;;  %vm4350_vm3 = vcmask 457728  }
 0x2d3   : > { %966 = vst [vmem:[#allocation2 + $0x180] sm:$0xf0] %v952_v4  ;;  %v1207_v54 = vpop.permute.xlu1 %1206 }
 0x2d4   : > { %v1217_v56 = vsel %vm4340_vm7, %v3773_v26, %v1207_v54  ;;  %vm4351_vm7 = vcmask 48128  }
 0x2d5   : > { %1231 = vst [vmem:[#allocation2 + $0x250] sm:$0xf] %v1217_v56  ;;  %v1020_v40 = vpop.permute.xlu0 %1019 }
 0x2d6   : > { %v1028_v63 = vsel %vm4341_vm9, %v4031_v22, %v1020_v40  ;;  %v1531_v19 = vld [vmem:[#allocation2 + $0x220] sm:$0xff]  ;;  %vm4352_vm9 = vcmask 449536  }
 0x2d7   : > { %1042 = vst [vmem:[#allocation2 + $0x1b8] sm:$0xf0] %v1028_v63  ;;  %v1245_v13 = vpop.permute.xlu1 %1244  ;;  %v2366_v14 = vpack.c.bf16 %v1531_v19, %v1524_v10 }
 0x2d8   : > { %v1255_v62 = vsel %vm4342_vm8, %v3782_v39, %v1245_v13  ;;  %vm4353_vm8 = vmmov %vm4343_vm11 }
 0x2d9   : > { %1269 = vst [vmem:[#allocation2 + $0x250] sm:$0xf0] %v1255_v62  ;;  %v4073_v27 = vpop.permute.xlu0 %1208  ;;  %2367 = vmatprep.subr.bf16.mxu0 %v2366_v14 }
 0x2da   : > { %v1218_v26 = vsel %vm4343_vm11, %v1207_v54, %v4073_v27  ;;  %2369 = vmatpush1.bf16.msra.mxu0 %v2368_v17  ;;  %v1511_v34 = vld [vmem:[#allocation2 + $0x180] sm:$0xff]  ;;  %vm4354_vm11 = vmmov %vm4347_vm0 }
 0x2db   : > { %1232 = vst [vmem:[#allocation2 + $0x258] sm:$0xf] %v1218_v26  ;;  %v1283_v48 = vpop.permute.xlu1 %1282 }
 0x2dc   : > { %v1293_v22 = vsel %vm4344_vm4, %v3791_v47, %v1283_v48  ;;  %vm4355_vm4 = vmmov %vm4345_vm6 }
 0x2dd   : > { %1307 = vst [vmem:[#allocation2 + $0x288] sm:$0xf] %v1293_v22  ;;  %v4079_v20 = vpop.permute.xlu0 %1246 }
 0x2de   : > { %v1256_v39 = vsel %vm4345_vm6, %v1245_v13, %v4079_v20  ;;  %v1518_v25 = vld [vmem:[#allocation2 + $0x1b8] sm:$0xff]  ;;  %vm4356_vm6 = vmmov %vm4349_vm2 }
 0x2df   : > { %1270 = vst [vmem:[#allocation2 + $0x258] sm:$0xf0] %v1256_v39  ;;  %v1321_v18 = vpop.permute.xlu1 %1320  ;;  %v2390_v43 = vpack.c.bf16 %v1518_v25, %v1511_v34 }
 0x2e0   : > { %v1331_v32 = vsel %vm4346_vm13, %v3799_v50, %v1321_v18  ;;  %v1537_v7 = vld [vmem:[#allocation2 + $0x250] sm:$0xff] }
 0x2e1   : > { %1345 = vst [vmem:[#allocation2 + $0x288] sm:$0xf0] %v1331_v32  ;;  %2391 = vmatpush3.bf16.msra.mxu1 %v2390_v43  ;;  %v1285_v53 = vpop.permute.xlu0 %1284 }
 0x2e2   : > { %v1294_v44 = vsel %vm4347_vm0, %v1283_v48, %v1285_v53  ;;  %2392 = vmatprep.subr.bf16.mxu1 %v2901_v11 }
 0x2e3   : > { %1308 = vst [vmem:[#allocation2 + $0x290] sm:$0xf] %v1294_v44  ;;  %v1058_v47 = vpop.permute.xlu1 %1057 }
 0x2e4   : > { %v1066_v59 = vsel %vm4348_vm1, %v4044_v24, %v1058_v47 }
 0x2e5   : > { %1080 = vst [vmem:[#allocation2 + $0x1f0] sm:$0xf] %v1066_v59  ;;  %v1323_v28 = vpop.permute.xlu0 %1322  ;;  %v1901_v59 = vlaneseq }
 0x2e6   : > { %v1332_v8 = vsel %vm4349_vm2, %v1321_v18, %v1323_v28  ;;  %v1538_v2 = vld [vmem:[#allocation2 + $0x258] sm:$0xff] }
 0x2e7   : > { %1346 = vst [vmem:[#allocation2 + $0x290] sm:$0xf0] %v1332_v8  ;;  %v1134_v45 = vpop.permute.xlu1 %1133  ;;  %v1902_v8 = vshrl.u32 %v1901_v59, 7 }
 0x2e8   : > { %v1142_v50 = vsel %vm4350_vm3, %v1132_v61, %v1134_v45  ;;  %v1544_v24 = vld [vmem:[#allocation2 + $0x288] sm:$0xff] }
 0x2e9   : > { %1156 = vst [vmem:[#allocation2 + $0x228] sm:$0xf] %v1142_v50  ;;  %v1096_v21 = vpop.permute.xlu0 %1095  ;;  %v2372_v42 = vpack.c.bf16 %v1544_v24, %v1537_v7  ;;  %v1903_v45 = vsub.s32 0, %v1902_v8  ;;  %v1907_v50 = vsub.s32 1, %v1902_v8  ;;  %v1911_v37 = vsub.s32 2, %v1902_v8 }
 0x2ea   : > { %v1104_v46 = vsel %vm4351_vm7, %v4050_v52, %v1096_v21  ;;  %v1915_v24 = vsub.s32 3, %v1902_v8  ;;  %v1923_v7 = vsub.s32 5, %v1902_v8 }
 0x2eb   : > { %1118 = vst [vmem:[#allocation2 + $0x1f0] sm:$0xf0] %v1104_v46  ;;  %v1359_v58 = vpop.permute.xlu1 %1358 }
 0x2ec   : > { %v1369_v29 = vsel %vm1364_vm14, %v3874_v5, %v1359_v58 }
 0x2ed   : > { %1383 = vst [vmem:[#allocation2 + $0x2c0] sm:$0xf] %v1369_v29  ;;  %v1173_v33 = vpop.permute.xlu0 %1172 }
 0x2ee   : > { %v1181_v15 = vsel %vm4352_vm9, %v4060_v35, %v1173_v33  ;;  %v1545_v6 = vld [vmem:[#allocation2 + $0x290] sm:$0xff] }
 0x2ef   : > { %1195 = vst [vmem:[#allocation2 + $0x228] sm:$0xf0] %v1181_v15  ;;  %v1397_v23 = vpop.permute.xlu1 %1396  ;;  %v2370_v31 = vpack.c.bf16 %v1545_v6, %v1538_v2  ;;  %v1919_v15 = vsub.s32 4, %v1902_v8 }
 0x2f0   : > { %v1407_v52 = vsel %vm1402_vm15, %v3887_v55, %v1397_v23 }
 0x2f1   : > { %1421 = vst [vmem:[#allocation2 + $0x2c0] sm:$0xf0] %v1407_v52  ;;  %v1361_v0 = vpop.permute.xlu0 %1360  ;;  %2371 = vmatprep.subr.bf16.mxu0 %v2370_v31 }
 0x2f2   : > { %v1370_v5 = vsel %vm1364_vm14, %v1359_v58, %v1361_v0  ;;  %2373 = vmatpush1.bf16.msra.mxu0 %v2372_v42  ;;  %v1525_v49 = vld [vmem:[#allocation2 + $0x1f0] sm:$0xff] }
 0x2f3   : > { %1384 = vst [vmem:[#allocation2 + $0x2c8] sm:$0xf] %v1370_v5  ;;  %v1435_v57 = vpop.permute.xlu1 %1434 }
 0x2f4   : > { %v1445_v61 = vsel %vm1440_vm12, %v3901_v12, %v1435_v57 }
 0x2f5   : > { %1459 = vst [vmem:[#allocation2 + $0x2f8] sm:$0xf] %v1445_v61  ;;  %v1399_v60 = vpop.permute.xlu0 %1398 }
 0x2f6   : > { %v1408_v38 = vsel %vm1402_vm15, %v1397_v23, %v1399_v60  ;;  %v1532_v35 = vld [vmem:[#allocation2 + $0x228] sm:$0xff] }
 0x2f7   : > { %1422 = vst [vmem:[#allocation2 + $0x2c8] sm:$0xf0] %v1408_v38  ;;  %v1211_v55 = vpop.permute.xlu1 %1210  ;;  %v2393_v51 = vpack.c.bf16 %v1532_v35, %v1525_v49  ;;  %v1927_v38 = vsub.s32 6, %v1902_v8 }
 0x2f8   : > { %v1219_v41 = vsel %vm4353_vm8, %v4073_v27, %v1211_v55  ;;  %v1551_v17 = vld [vmem:[#allocation2 + $0x2c0] sm:$0xff] }
 0x2f9   : > { %1233 = vst [vmem:[#allocation2 + $0x260] sm:$0xf] %v1219_v41  ;;  %2394 = vmatpush3.bf16.msra.mxu1 %v2393_v51  ;;  %v1437_v30 = vpop.permute.xlu0 %1436 }
 0x2fa   : > { %v1446_v3 = vsel %vm1440_vm12, %v1435_v57, %v1437_v30  ;;  %2395 = vmatprep.subr.bf16.mxu1 %v2901_v11 }
 0x2fb   : > { %1460 = vst [vmem:[#allocation2 + $0x300] sm:$0xf] %v1446_v3  ;;  %v1287_v12 = vpop.permute.xlu1 %1286 }
 0x2fc   : > { %v1295_v4 = vsel %vm4354_vm11, %v1285_v53, %v1287_v12  ;;  %v1558_v10 = vld [vmem:[#allocation2 + $0x2f8] sm:$0xf] }
 0x2fd   : > { %1309 = vst [vmem:[#allocation2 + $0x298] sm:$0xf] %v1295_v4  ;;  %v1249_v54 = vpop.permute.xlu0 %1248  ;;  %v2377_v26 = vpack.c.bf16 %v1558_v10, %v1551_v17 }
 0x2fe   : > { %v1257_v56 = vsel %vm4355_vm4, %v4079_v20, %v1249_v54  ;;  %v1552_v13 = vld [vmem:[#allocation2 + $0x2c8] sm:$0xff] }
 0x2ff   : > { %1271 = vst [vmem:[#allocation2 + $0x260] sm:$0xf0] %v1257_v56  ;;  %v1363_v40 = vpop.permute.xlu1 %1362 }
 0x300   : > { %v1371_v1 = vsel %vm1364_vm14, %v1361_v0, %v1363_v40 }
 0x301   : > { %1385 = vst [vmem:[#allocation2 + $0x2d0] sm:$0xf] %v1371_v1  ;;  %v1325_v63 = vpop.permute.xlu0 %1324 }
 0x302   : > { %v1333_v19 = vsel %vm4356_vm6, %v1323_v28, %v1325_v63  ;;  %v1559_v14 = vld [vmem:[#allocation2 + $0x300] sm:$0xf]  ;;  %v1898_v28 = vld [vmem:[#allocation11] sm:$0xff] }
 0x303   : > { %1347 = vst [vmem:[#allocation2 + $0x298] sm:$0xf0] %v1333_v19  ;;  %v1439_v16 = vpop.permute.xlu1 %1438  ;;  %v2374_v62 = vpack.c.bf16 %v1559_v14, %v1552_v13 }
 0x304   : > { %v1447_v27 = vsel %vm1440_vm12, %v1437_v30, %v1439_v16  ;;  %vm1899_vm12 = vcmp.gt.f32.partialorder %v1898_v28, 0.0 }
 0x305   : > { %1461 = vst [vmem:[#allocation2 + $0x308] sm:$0xf] %v1447_v27  ;;  %v1401_v48 = vpop.permute.xlu0 %1400  ;;  %2376 = vmatprep.subr.msk.bf16.mxu0 %vm3844_vm10, %v2374_v62 }
 0x306   : > { %v1409_v22 = vsel %vm1402_vm15, %v1399_v60, %v1401_v48  ;;  %2379 = vmatpush1.bf16.msk.msra.mxu0 %vm3844_vm10, %v2377_v26  ;;  %v1539_v20 = vld [vmem:[#allocation2 + $0x260] sm:$0xff] }
 0x307   : > { %1423 = vst [vmem:[#allocation2 + $0x2d0] sm:$0xf0] %v1409_v22 }
 0x309   : > { %2238 = vmatmul.mubr.msk.f32.vlgmr.msra.gmra.mrb[2].mxu0 %vm679_vm5, %v3868_v36 }
 0x30a   : > { %v1546_v39 = vld [vmem:[#allocation2 + $0x298] sm:$0xff] }
 0x30b   : > { %v2396_v34 = vpack.c.bf16 %v1546_v39, %v1539_v20 }
 0x30c   : > { %v1560_v18 = vld [vmem:[#allocation2 + $0x308] sm:$0xf] }
 0x30d   : > { %2397 = vmatpush3.bf16.msra.mxu1 %v2396_v34 }
 0x30e   : > { %2398 = vmatprep.subr.bf16.mxu1 %v2901_v11  ;;  %v1553_v25 = vld [vmem:[#allocation2 + $0x2d0] sm:$0xff]  ;;  %v1900_v11 = vsel %vm1899_vm12, 1, %v2903_v9 }
 0x30f   : > { %v2399_v43 = vpack.c.bf16 %v1560_v18, %v1553_v25  ;;  %v1904_v21 = vrot.slane %v1900_v11, %v1903_v45  ;;  %v1908_v46 = vrot.slane %v1900_v11, %v1907_v50  ;;  %v1916_v23 = vrot.slane %v1900_v11, %v1915_v24  ;;  %v1984_v24 = vld [vmem:[#allocation12] sm:$0xff] }
 0x310   : > { %v1920_v31 = vrot.slane %v1900_v11, %v1919_v15  ;;  %v1924_v60 = vrot.slane %v1900_v11, %v1923_v7  ;;  %v1928_v41 = vrot.slane %v1900_v11, %v1927_v38 }
 0x311   : > { %2401 = vmatpush3.bf16.msk.msra.mxu1 %vm3844_vm10, %v2399_v43  ;;  %vm1930_vm10 = vcmp.eq.s32.totalorder %v1908_v46, 1  ;;  %vm1932_vm15 = vcmp.eq.s32.totalorder %v1916_v23, 1 }
 0x312   : > { %vm1933_vm13 = vcmp.eq.s32.totalorder %v1920_v31, 1  ;;  %vm1934_vm0 = vcmp.eq.s32.totalorder %v1924_v60, 1  ;;  %vm1935_vm1 = vcmp.eq.s32.totalorder %v1928_v41, 1 }
 0x314   : > { %2288 = vmatmul.mubr.msk.f32.vlgmr.msra.gmra.mrb[2].mxu1 %vm679_vm5, %v3868_v36  ;;  %v1912_v36 = vrot.slane %v1900_v11, %v1911_v37  ;;  %vm1929_vm5 = vcmp.eq.s32.totalorder %v1904_v21, 1 }
 0x316   : > { %v1565_v58 = vpop.permute.xlu0 %1564  ;;  %vm1931_vm14 = vcmp.eq.s32.totalorder %v1912_v36, 1 }
 0x33f   : > { %v1658_v32 = vpop.f32.mrb[0].mxu0 }
 0x340   : > { %v1660_v53 = vpop.f32.mrb[1].mxu0  ;;  %v4126_v29 = vadd.f32 %v1658_v32, %v1565_v58 }
 0x341   : > { %v4128_v33 = vadd.f32 %v1660_v53, %v1565_v58 }
 0x342   : > { %v1936_v6 = vsel %vm1929_vm5, %v4126_v29, 0.0 }
 0x343   : > { %v1937_v9 = vsel %vm1930_vm10, %v4128_v33, 0.0 }
 0x344   : > { %v1943_v52 = vadd.f32 %v1937_v9, %v1936_v6  ;;  %v1986_v9 = vld [vmem:[#allocation14] sm:$0xff] }
 0x358   : > { %v1729_v44 = vpop.f32.mrb[0].mxu1 }
 0x359   : > { %v1731_v47 = vpop.f32.mrb[1].mxu1  ;;  %v4130_v2 = vadd.f32 %v1729_v44, %v1565_v58 }
 0x35a   : > { %v4136_v42 = vadd.f32 %v1731_v47, %v1565_v58 }
 0x35b   : > { %v1938_v5 = vsel %vm1931_vm14, %v4130_v2, 0.0 }
 0x35c   : > { %v1944_v49 = vadd.f32 %v1943_v52, %v1938_v5  ;;  %v1939_v35 = vsel %vm1932_vm15, %v4136_v42, 0.0 }
 0x35e   : > { %v1945_v30 = vadd.f32 %v1944_v49, %v1939_v35 }
 0x3dc   : > { %v1800_v0 = vpop.f32.mrb[2].mxu0 }
 0x3dd   : > { %v1802_v57 = vpop.f32.mrb[3].mxu0  ;;  %v4140_v61 = vadd.f32 %v1800_v0, %v1565_v58 }
 0x3de   : > { %v4144_v55 = vadd.f32 %v1802_v57, %v1565_v58 }
 0x3df   : > { %v1940_v51 = vsel %vm1933_vm13, %v4140_v61, 0.0 }
 0x3e0   : > { %v1946_v3 = vadd.f32 %v1945_v30, %v1940_v51  ;;  %v1941_v12 = vsel %vm1934_vm0, %v4144_v55, 0.0 }
 0x3e2   : > { %v1947_v40 = vadd.f32 %v1946_v3, %v1941_v12 }
 0x3e7   : > { %v1871_v4 = vpop.f32.mrb[2].mxu1 }
 0x3e8   : > { %v1872_v54 = vadd.f32 %v1871_v4, %v1565_v58  ;;  %v2289_v56 = vpop.f32.mrb[3].mxu1 }
 0x3ea   : > { %v1942_v1 = vsel %vm1935_vm1, %v1872_v54, 0.0 }
 0x3eb   : > { %v1948_v63 = vadd.f32 %v1947_v40, %v1942_v1 }
 0x3ed   : > { %1949 = vadd.xlane.f32.xlu1 %v1948_v63 }
 0x47a   : > { %v1950_v10 = vpop.xlane.xlu1 %1949 }
 0x47b   : > { %v1951_v19 = vmul.f32 0.001953125, %v1950_v10 }
 0x47d   : > { %v1952_v13 = vsub.f32 %v4126_v29, %v1951_v19  ;;  %v1953_v14 = vsub.f32 %v4128_v33, %v1951_v19  ;;  %v1954_v16 = vsub.f32 %v4130_v2, %v1951_v19  ;;  %v1955_v62 = vsub.f32 %v4136_v42, %v1951_v19 }
 0x47e   : > { %v1956_v26 = vsub.f32 %v4140_v61, %v1951_v19  ;;  %v1957_v39 = vsub.f32 %v4144_v55, %v1951_v19  ;;  %v1958_v43 = vsub.f32 %v1872_v54, %v1951_v19 }
 0x47f   : > { %v1959_v17 = vsel %vm1929_vm5, %v1952_v13, 0.0  ;;  %v1960_v27 = vsel %vm1930_vm10, %v1953_v14, 0.0  ;;  %v1961_v48 = vsel %vm1931_vm14, %v1954_v16, 0.0  ;;  %v1962_v34 = vsel %vm1932_vm15, %v1955_v62, 0.0 }
 0x480   : > { %v1966_v22 = vmul.f32 %v1959_v17, %v1959_v17  ;;  %v1967_v20 = vmul.f32 %v1960_v27, %v1960_v27  ;;  %v1968_v25 = vmul.f32 %v1961_v48, %v1961_v48  ;;  %v1963_v32 = vsel %vm1933_vm13, %v1956_v26, 0.0 }
 0x481   : > { %v1969_v53 = vmul.f32 %v1962_v34, %v1962_v34  ;;  %v1964_v47 = vsel %vm1934_vm0, %v1957_v39, 0.0  ;;  %v1970_v59 = vmul.f32 %v1963_v32, %v1963_v32  ;;  %v1965_v8 = vsel %vm1935_vm1, %v1958_v43, 0.0 }
 0x482   : > { %v1973_v18 = vadd.f32 %v1967_v20, %v1966_v22  ;;  %v1971_v45 = vmul.f32 %v1964_v47, %v1964_v47  ;;  %v1972_v11 = vmul.f32 %v1965_v8, %v1965_v8 }
 0x484   : > { %v1974_v44 = vadd.f32 %v1973_v18, %v1968_v25 }
 0x486   : > { %v1975_v28 = vadd.f32 %v1974_v44, %v1969_v53 }
 0x488   : > { %v1976_v50 = vadd.f32 %v1975_v28, %v1970_v59 }
 0x48a   : > { %v1977_v21 = vadd.f32 %v1976_v50, %v1971_v45 }
 0x48c   : > { %v1978_v46 = vadd.f32 %v1977_v21, %v1972_v11 }
 0x48e   : > { %1979 = vadd.xlane.f32.xlu0 %v1978_v46 }
 0x51b   : > { %v1980_v58 = vpop.xlane.xlu0 %1979 }
 0x51c   : > { %v1981_v37 = vmul.f32 0.001953125, %v1980_v58 }
 0x51e   : > { %v1982_v36 = vadd.f32 1e-05, %v1981_v37 }
 0x520   : > { %2563 = vrsqrt.f32 %v1982_v36 }
 0x52a   : > { %v2564_v15 = vpop.eup %2563 }
 0x52b   : > { %v1985_v6 = vmul.f32 %v2564_v15, %v1984_v24 }
 0x52d   : > { %1991 = vperm.xlu1 %2558, %v1985_v6   ;;  %v1987_v23 = vmul.f32 %v1985_v6, %v1951_v19 }
 0x52f   : > { %v1988_v31 = vsub.f32 %v1986_v9, %v1987_v23 }
 0x531   : > { %2003 = vperm.xlu0 %2557, %v1988_v31  }
 0x5ac   : > { %v1992_v7 = vpop.permute.xlu1 %1991 }
 0x5ad   : > { %v1994_v52 = vmul.f32 %v1992_v7, %v4126_v29  ;;  %v1995_v0 = vmul.f32 %v1992_v7, %v4128_v33  ;;  %v1996_v5 = vmul.f32 %v1992_v7, %v4130_v2  ;;  %v1997_v57 = vmul.f32 %v1992_v7, %v4136_v42 }
 0x5ae   : > { %v1998_v60 = vmul.f32 %v1992_v7, %v4140_v61  ;;  %v1999_v38 = vmul.f32 %v1992_v7, %v4144_v55  ;;  %v2000_v49 = vmul.f32 %v1992_v7, %v1872_v54 }
 0x5b0   : > { %v2004_v35 = vpop.permute.xlu0 %2003 }
 0x5b1   : > { %v2006_v51 = vadd.f32 %v2004_v35, %v1994_v52  ;;  %v2007_v41 = vadd.f32 %v2004_v35, %v1995_v0  ;;  %v2008_v30 = vadd.f32 %v2004_v35, %v1996_v5  ;;  %v2009_v3 = vadd.f32 %v2004_v35, %v1997_v57 }
 0x5b2   : > { %v2010_v12 = vadd.f32 %v2004_v35, %v1998_v60  ;;  %v2011_v4 = vadd.f32 %v2004_v35, %v1999_v38  ;;  %v2012_v29 = vadd.f32 %v2004_v35, %v2000_v49 }
 0x5b3   : > { %vm2013_vm2 = vcmp.ge.f32.partialorder %v2006_v51, 0.0  ;;  %vm2014_vm3 = vcmp.ge.f32.partialorder %v2007_v41, 0.0  ;;  %vm2015_vm7 = vcmp.ge.f32.partialorder %v2008_v30, 0.0  ;;  %vm2016_vm9 = vcmp.ge.f32.partialorder %v2009_v3, 0.0 }
 0x5b4   : > { %vm2017_vm8 = vcmp.ge.f32.partialorder %v2010_v12, 0.0  ;;  %vm2018_vm11 = vcmp.ge.f32.partialorder %v2011_v4, 0.0  ;;  %vm2019_vm4 = vcmp.ge.f32.partialorder %v2012_v29, 0.0  ;;  %v2020_v33 = vmul.f32 0.01, %v2006_v51 }
 0x5b5   : > { %v2021_v2 = vmul.f32 0.01, %v2007_v41  ;;  %v2022_v42 = vmul.f32 0.01, %v2008_v30  ;;  %v2023_v61 = vmul.f32 0.01, %v2009_v3 }
 0x5b6   : > { %v2024_v55 = vmul.f32 0.01, %v2010_v12  ;;  %v2025_v54 = vmul.f32 0.01, %v2011_v4  ;;  %v2026_v56 = vmul.f32 0.01, %v2012_v29  ;;  %v2027_v40 = vsel %vm2013_vm2, %v2006_v51, %v2020_v33 }
 0x5b7   : > { %v2028_v1 = vsel %vm2014_vm3, %v2007_v41, %v2021_v2  ;;  %v2029_v63 = vsel %vm2015_vm7, %v2008_v30, %v2022_v42  ;;  %v2030_v10 = vsel %vm2016_vm9, %v2009_v3, %v2023_v61  ;;  %2034 = vst [vmem:[%s429_s4] sm:$0xff] %v2027_v40 }
 0x5b8   : > { %v2031_v19 = vsel %vm2017_vm8, %v2010_v12, %v2024_v55  ;;  %v2032_v13 = vsel %vm2018_vm11, %v2011_v4, %v2025_v54  ;;  %v2033_v14 = vsel %vm2019_vm4, %v2012_v29, %v2026_v56  ;;  %2035 = vst [vmem:[%s429_s4 + $0x8] sm:$0xff] %v2028_v1  ;;  %2036 = vst [vmem:[%s429_s4 + $0x10] sm:$0xff] %v2029_v63 }
 0x5b9   : > { %2037 = vst [vmem:[%s429_s4 + $0x18] sm:$0xff] %v2030_v10  ;;  %2038 = vst [vmem:[%s429_s4 + $0x20] sm:$0xff] %v2031_v19 }
 0x5ba   : > { %2039 = vst [vmem:[%s429_s4 + $0x28] sm:$0xff] %v2032_v13  ;;  %2040 = vst [vmem:[%s429_s4 + $0x30] sm:$0xff] %v2033_v14 }
 0x5bb   : > { %2779 = shalt.err (!%p2776_p3)
}
 0x5bc   : > { %s2780_s5 = scalar_lea.hbm %s4179_s8, 896  ;;  %s2784_s12 = scalar_lea.hbm %s4238_s7, 1792 }
 0x5bd   : > { %p2781_p5 = scmp.ne.s32.totalorder %s4179_s8, %s2780_s5  ;;  %p2785_p8 = scmp.lt.u32.totalorder %s4179_s8, %s4238_s7 }
 0x5be   : > { %p2786_p9 = scmp.lt.u32.totalorder %s2784_s12, %s2780_s5  ;;  %p2788_p6 = scmp.lt.u32.totalorder %s2780_s5, %s4179_s8 }
 0x5bf   : > { %p2782_p7 = pnand %p2781_p5, %p4357_p10 }
 0x5c0   : > { %p2787_p1 = por %p2786_p9, %p2785_p8 }
 0x5c1   : > { %p2783_p0 = pneg %p2782_p7 }
 0x5c2   : > { %p2789_p13 = por %p2788_p6, %p2787_p1 }
 0x5c4   : > { %p2790_p2 = pnand %p2789_p13, %p2783_p0 }
 0x5c6   : > { %2793 = shalt.err (!%p2790_p2)
}
 0x5c7   : > { %2432 = dma.vmem_to_hbm [thread:$0]  (%p4357_p10), %s4181_s2, 896, %s4179_s8, %s2042_s13  }
 0x5c8 PF: > { %s2068_s11 = sand.u32 1, %s2844_s24   ;;  %p4358_p11 = scmp.ne.s32.totalorder %s4293_s20, 0 }
 0x5c9   : > { %p4359_p12 = scmp.ge.s32.totalorder %s2864_s29, 2  ;;  %s2069_s21 = scalar_lea.sflag [#allocation5], %s2068_s11 }
 0x5cb   : > { %p2458_p4 = pnand %p4359_p12, %p4358_p11 }
 0x5cd   : > { %2839 = dma.done.wait (!%p2458_p4), %s2069_s21, 896  }
 0x5ce   : > { %2841 = vsyncadd (!%p2458_p4), %s2069_s21, 4294966400  ;;  %s28_s29 = sadd.s32 1, %s2864_s29   ;;  %s4360_s24 = smov %s2848_s25 }
 0x5cf   : > { %p25_p3 = scmp.ge.s32.totalorder %s28_s29, 4   ;;  %s4361_s25 = smov %s2852_s26 }
 0x5d0   : > { %s4362_s26 = smov %s3133_s19  ;;  %s4363_s27 = smov %s2860_s28 }
 0x5d1   : > { %s4364_s28 = smov %s4366_s9  ;;  %27 = sbr.rel (!%p25_p3) target bundleno = 16 (0x10), region = 131 }
 0x5d8   :  { %2074 = vsyncpa [#allocation4], 1 }
 0x5d9   :  { %2076 = vsyncpa [#allocation4 + $0x1], 1 }
 0x5da   :  { %2077 = vsyncpa [#allocation7], 1 }
 0x5db   :  { %2079 = vsyncpa [#allocation7 + $0x1], 1 }
 0x5dc   :  { %2080 = vsyncpa [#allocation10], 1 }
 0x5dd   :  { %2081 = vsyncpa [#allocation13], 1 }
 0x5de   :  { %2082 = vsyncpa [#allocation5], 1 }
 0x5df   :  { %2084 = vsyncpa [#allocation5 + $0x1], 1 }

</bundles_post_ra>
